<compile_context>
chip_gen: v7x
topology: tpu7x:2x2x1
jax: 0.10.0
libtpu: 0.0.40
codegen_flags: <defaults>
</compile_context>

<pallas_src>
import math

import jax
import jax.numpy as jnp
from jax import lax
from jax.experimental import pallas as pl
from jax.experimental.pallas import tpu as pltpu

block_size = 128   # max context length (causal-mask buffer size in the PyTorch module)
n_embd = 384
head_size = 64


def _head_kernel(x_ref, wqkv_ref, o_ref):
    """One grid step = one group of G batch elements.

    x_ref    : (G, T, C)  VMEM, compute dtype (bf16 or f32)
    wqkv_ref : (C, 3H)    VMEM, compute dtype; [Wq*scale | Wk | Wv] transposed
    o_ref    : (T, G*H)   VMEM, lane-dense output slab
    """
    G, T, C = x_ref.shape
    H = wqkv_ref.shape[1] // 3

    # Fused QKV projection for the whole group: one (G*T, C) @ (C, 3H) MXU matmul
    # with f32 accumulation.  (G,T,C)->(G*T,C) only merges leading dims, so it is
    # compatible with the (8,128) tiling (no real data movement).
    x = x_ref[...].reshape(G * T, C)
    qkv = jnp.dot(x, wqkv_ref[...], preferred_element_type=jnp.float32)  # (G*T, 3H)
    qkv = qkv.astype(x.dtype)                       # back to compute dtype for MXU feeds

    # Causal mask, shared across the group.
    row = lax.broadcasted_iota(jnp.int32, (T, T), 0)
    col = lax.broadcasted_iota(jnp.int32, (T, T), 1)
    causal = col <= row

    outs = []
    for g in range(G):                              # static tiny loop (G = 2 for H = 64)
        q = qkv[g * T:(g + 1) * T, :H]              # 1/sqrt(H) already folded into Wq
        k = qkv[g * T:(g + 1) * T, H:2 * H]
        v = qkv[g * T:(g + 1) * T, 2 * H:]

        # (T, T) attention scores, contracting on the head dim (no explicit k.T).
        wei = lax.dot_general(q, k, (((1,), (1,)), ((), ())),
                              preferred_element_type=jnp.float32)
        wei = jnp.where(causal, wei, -jnp.inf)

        # Numerically-stable softmax in f32 (diagonal always unmasked -> s > 0).
        m = jnp.max(wei, axis=-1, keepdims=True)
        e = jnp.exp(wei - m)
        s = jnp.sum(e, axis=-1, keepdims=True)
        p = (e * pl.reciprocal(s, approx=True)).astype(x.dtype)   # (T, T)

        outs.append(jnp.dot(p, v, preferred_element_type=jnp.float32))   # (T, H)

    # Single full-width (>= 128-lane) store of the whole slab.
    slab = outs[0] if G == 1 else jnp.concatenate(outs, axis=-1)         # (T, G*H)
    o_ref[...] = slab.astype(o_ref.dtype)


def head_forward(x, w_query, w_key, w_value, *, compute_dtype=jnp.bfloat16):
    """Forward pass of the PyTorch Head module (eval mode).

    x        : (B, T, C)
    w_query, w_key, w_value : (H, C) nn.Linear weights (out_features, in_features)
    compute_dtype : dtype fed to the MXU (bf16 halves HBM traffic on v6e/v7x).
    """
    B, T, C = x.shape
    H = w_query.shape[0]
    assert T <= block_size and C == w_query.shape[1]

    # Fold 1/sqrt(H) into Wq, build the fused (C, 3H) weight, cast once.
    scale = jnp.float32(H) ** -0.5
    wqkv = jnp.concatenate(
        [(w_query.astype(jnp.float32) * scale).T,
         w_key.astype(jnp.float32).T,
         w_value.astype(jnp.float32).T],
        axis=1,
    ).astype(compute_dtype)                         # (C, 3H)
    x_c = x.astype(compute_dtype)

    # Group G batch elements per grid step so the output slab width G*H is a
    # multiple of 128 lanes -> unmasked stores.  Pad B up to a multiple of G.
    G = 128 // math.gcd(H, 128) if H % 128 else 1
    Bp = pl.cdiv(B, G) * G
    if Bp != B:
        x_c = jnp.pad(x_c, ((0, Bp - B), (0, 0), (0, 0)))

    out_flat = pl.pallas_call(
        _head_kernel,
        out_shape=jax.ShapeDtypeStruct((T, Bp * H), x.dtype),
        grid_spec=pltpu.PrefetchScalarGridSpec(
            num_scalar_prefetch=0,
            grid=(Bp // G,),
            in_specs=[
                pl.BlockSpec((G, T, C), lambda g: (g, 0, 0)),   # per-group x tile
                pl.BlockSpec((C, 3 * H), lambda g: (0, 0)),     # fused Wqkv (full, resident)
            ],
            out_specs=pl.BlockSpec((T, G * H), lambda g: (0, g)),
        ),
        compiler_params=pltpu.CompilerParams(
            dimension_semantics=("parallel",),      # groups are independent (megacore / v7x)
        ),
    )(x_c, wqkv)

    # Layout plumbing outside the kernel: (T, Bp*H) -> (Bp, T, H) -> (B, T, H).
    out = out_flat.reshape(T, Bp, H).transpose(1, 0, 2)
    return out[:B]


def head_reference(x, w_query, w_key, w_value):
    """Pure-JAX f32 reference of the PyTorch forward (eval mode)."""
    q = x @ w_query.T
    k = x @ w_key.T
    v = x @ w_value.T
    T = x.shape[1]
    wei = (q @ jnp.swapaxes(k, -2, -1)) * (k.shape[-1] ** -0.5)
    tril = jnp.tril(jnp.ones((T, T), dtype=bool))
    wei = jnp.where(tril, wei, -jnp.inf)
    wei = jax.nn.softmax(wei, axis=-1)
    return wei @ v


if __name__ == "__main__":
    key = jax.random.PRNGKey(0)
    kx, kq, kk, kv = jax.random.split(key, 4)

    B, T, C, H = 2, 128, n_embd, head_size

    x = jax.random.normal(kx, (B, T, C), dtype=jnp.float32)
    # nn.Linear-style weights: (head_size, n_embd), uniform(-1/sqrt(C), 1/sqrt(C)).
    bound = 1.0 / (C ** 0.5)
    w_q = jax.random.uniform(kq, (H, C), jnp.float32, -bound, bound)
    w_k = jax.random.uniform(kk, (H, C), jnp.float32, -bound, bound)
    w_v = jax.random.uniform(kv, (H, C), jnp.float32, -bound, bound)

    ref = head_reference(x, w_q, w_k, w_v)

    # f32 compute path (approx reciprocal adds ~1e-3 relative error).
    out_f32 = jax.block_until_ready(
        head_forward(x, w_q, w_k, w_v, compute_dtype=jnp.float32))
    assert out_f32.shape == (B, T, H)
    assert jnp.allclose(out_f32, ref, atol=1e-2, rtol=1e-2), "f32 path mismatch"

    # Default bf16 compute path (f32 accumulation, f32 softmax).
    out_bf16 = jax.block_until_ready(head_forward(x, w_q, w_k, w_v))
    assert out_bf16.shape == (B, T, H)
    assert jnp.allclose(out_bf16, ref, atol=5e-2, rtol=5e-2), "bf16 path mismatch"

    print("KERNEL_OK")
</pallas_src>

<mosaic_0001>
module attributes {stable_mosaic.version = 11 : i64} {
  func.func @_head_kernel(%arg0: i32, %arg1: memref<2x128x384xf32, #tpu.memory_space<vmem>>, %arg2: memref<384x192xf32, #tpu.memory_space<vmem>>, %arg3: memref<128x128xf32, #tpu.memory_space<vmem>>) attributes {dimension_semantics = [#tpu.dimension_semantics<parallel>], iteration_bounds = array<i64: 1>, scalar_prefetch = 0 : i64, scratch_operands = 0 : i64, tpu.core_type = #tpu.core_type<tc>, window_params = [{transform_indices = @transform_0, window_bounds = array<i64: 2, 128, 384>}, {pipeline_mode = #tpu.pipeline_mode<synchronous>, transform_indices = @transform_1, window_bounds = array<i64: 384, 192>}, {transform_indices = @transform_2, window_bounds = array<i64: 128, 128>}]} {
    %c0 = arith.constant 0 : index
    %c0_0 = arith.constant 0 : index
    %c0_1 = arith.constant 0 : index
    %0 = vector.load %arg1[%c0, %c0_0, %c0_1] : memref<2x128x384xf32, #tpu.memory_space<vmem>>, vector<2x128x384xf32>
    %1 = vector.shape_cast %0 : vector<2x128x384xf32> to vector<256x384xf32>
    %c0_2 = arith.constant 0 : index
    %c0_3 = arith.constant 0 : index
    %2 = vector.load %arg2[%c0_2, %c0_3] : memref<384x192xf32, #tpu.memory_space<vmem>>, vector<384x192xf32>
    %cst = arith.constant dense<0.000000e+00> : vector<256x192xf32>
    %3 = tpu.matmul %1, %2, %cst {dimension_numbers = #tpu.dot_dimension_numbers<[1], [0], [0], [1], [0, 0, 1, 1], [], []>} : vector<256x384xf32>, vector<384x192xf32>, vector<256x192xf32> -> vector<256x192xf32>
    %4 = tpu.iota {dimensions = array<i32: 0>} : vector<128x128xi32>
    %5 = tpu.iota {dimensions = array<i32: 1>} : vector<128x128xi32>
    %6 = arith.cmpi sle, %5, %4 : vector<128x128xi32>
    %7 = vector.extract_strided_slice %3 {offsets = [0, 0], sizes = [128, 64], strides = [1, 1]} : vector<256x192xf32> to vector<128x64xf32>
    %8 = vector.extract_strided_slice %3 {offsets = [0, 64], sizes = [128, 64], strides = [1, 1]} : vector<256x192xf32> to vector<128x64xf32>
    %9 = vector.extract_strided_slice %3 {offsets = [0, 128], sizes = [128, 64], strides = [1, 1]} : vector<256x192xf32> to vector<128x64xf32>
    %cst_4 = arith.constant dense<0.000000e+00> : vector<128x128xf32>
    %10 = tpu.matmul %7, %8, %cst_4 {dimension_numbers = #tpu.dot_dimension_numbers<[1], [1], [0], [0], [0, 0, 1, 0], [], []>} : vector<128x64xf32>, vector<128x64xf32>, vector<128x128xf32> -> vector<128x128xf32>
    %cst_5 = arith.constant 0xFF800000 : f32
    %11 = vector.broadcast %cst_5 : f32 to vector<128x128xf32>
    %12 = arith.select %6, %10, %11 : vector<128x128xi1>, vector<128x128xf32>
    %cst_6 = arith.constant dense<0xFF800000> : vector<128xf32>
    %13 = vector.multi_reduction <maximumf>, %12, %cst_6 [1] : vector<128x128xf32> to vector<128xf32>
    %14 = vector.shape_cast %13 : vector<128xf32> to vector<128x1xf32>
    %15 = vector.broadcast %14 : vector<128x1xf32> to vector<128x128xf32>
    %16 = arith.subf %12, %15 : vector<128x128xf32>
    %17 = math.exp %16 : vector<128x128xf32>
    %cst_7 = arith.constant dense<0.000000e+00> : vector<128xf32>
    %18 = vector.multi_reduction <add>, %17, %cst_7 [1] : vector<128x128xf32> to vector<128xf32>
    %19 = vector.shape_cast %18 : vector<128xf32> to vector<128x1xf32>
    %20 = tpu.reciprocal %19 {approx = true} : vector<128x1xf32> -> vector<128x1xf32>
    %21 = vector.broadcast %20 : vector<128x1xf32> to vector<128x128xf32>
    %22 = arith.mulf %17, %21 : vector<128x128xf32>
    %cst_8 = arith.constant dense<0.000000e+00> : vector<128x64xf32>
    %23 = tpu.matmul %22, %9, %cst_8 {dimension_numbers = #tpu.dot_dimension_numbers<[1], [0], [0], [1], [0, 0, 1, 1], [], []>} : vector<128x128xf32>, vector<128x64xf32>, vector<128x64xf32> -> vector<128x64xf32>
    %24 = vector.extract_strided_slice %3 {offsets = [128, 0], sizes = [128, 64], strides = [1, 1]} : vector<256x192xf32> to vector<128x64xf32>
    %25 = vector.extract_strided_slice %3 {offsets = [128, 64], sizes = [128, 64], strides = [1, 1]} : vector<256x192xf32> to vector<128x64xf32>
    %26 = vector.extract_strided_slice %3 {offsets = [128, 128], sizes = [128, 64], strides = [1, 1]} : vector<256x192xf32> to vector<128x64xf32>
    %cst_9 = arith.constant dense<0.000000e+00> : vector<128x128xf32>
    %27 = tpu.matmul %24, %25, %cst_9 {dimension_numbers = #tpu.dot_dimension_numbers<[1], [1], [0], [0], [0, 0, 1, 0], [], []>} : vector<128x64xf32>, vector<128x64xf32>, vector<128x128xf32> -> vector<128x128xf32>
    %cst_10 = arith.constant 0xFF800000 : f32
    %28 = vector.broadcast %cst_10 : f32 to vector<128x128xf32>
    %29 = arith.select %6, %27, %28 : vector<128x128xi1>, vector<128x128xf32>
    %cst_11 = arith.constant dense<0xFF800000> : vector<128xf32>
    %30 = vector.multi_reduction <maximumf>, %29, %cst_11 [1] : vector<128x128xf32> to vector<128xf32>
    %31 = vector.shape_cast %30 : vector<128xf32> to vector<128x1xf32>
    %32 = vector.broadcast %31 : vector<128x1xf32> to vector<128x128xf32>
    %33 = arith.subf %29, %32 : vector<128x128xf32>
    %34 = math.exp %33 : vector<128x128xf32>
    %cst_12 = arith.constant dense<0.000000e+00> : vector<128xf32>
    %35 = vector.multi_reduction <add>, %34, %cst_12 [1] : vector<128x128xf32> to vector<128xf32>
    %36 = vector.shape_cast %35 : vector<128xf32> to vector<128x1xf32>
    %37 = tpu.reciprocal %36 {approx = true} : vector<128x1xf32> -> vector<128x1xf32>
    %38 = vector.broadcast %37 : vector<128x1xf32> to vector<128x128xf32>
    %39 = arith.mulf %34, %38 : vector<128x128xf32>
    %cst_13 = arith.constant dense<0.000000e+00> : vector<128x64xf32>
    %40 = tpu.matmul %39, %26, %cst_13 {dimension_numbers = #tpu.dot_dimension_numbers<[1], [0], [0], [1], [0, 0, 1, 1], [], []>} : vector<128x128xf32>, vector<128x64xf32>, vector<128x64xf32> -> vector<128x64xf32>
    %41 = tpu.concatenate %23, %40 in 1 : vector<128x64xf32>, vector<128x64xf32> -> vector<128x128xf32>
    %c0_14 = arith.constant 0 : index
    %c0_15 = arith.constant 0 : index
    %42 = vector.load %arg3[%c0_14, %c0_15] : memref<128x128xf32, #tpu.memory_space<vmem>>, vector<128x128xf32>
    tpu.vector_store %arg3[%c0_14, %c0_15], %41 {strides = array<i32>} : memref<128x128xf32, #tpu.memory_space<vmem>>, vector<128x128xf32>,
    return
  }
  func.func @transform_0(%arg0: i32) -> (i32, i32, i32) {
    %c0_i32 = arith.constant 0 : i32
    %c0_i32_0 = arith.constant 0 : i32
    %c0_i32_1 = arith.constant 0 : i32
    return %arg0, %c0_i32, %c0_i32_0 : i32, i32, i32
  }
  func.func @transform_1(%arg0: i32) -> (i32, i32) {
    %c0_i32 = arith.constant 0 : i32
    %c0_i32_0 = arith.constant 0 : i32
    %c0_i32_1 = arith.constant 0 : i32
    return %c0_i32, %c0_i32_0 : i32, i32
  }
  func.func @transform_2(%arg0: i32) -> (i32, i32) {
    %c0_i32 = arith.constant 0 : i32
    %c0_i32_0 = arith.constant 0 : i32
    return %c0_i32, %arg0 : i32, i32
  }
}

</mosaic_0001>

<bundles_post_ra>
// kernel: tpu_custom_call.1
= control target key start
LH: loop header
LB: loop body
LE: loop exit
PB: predicated region body
PF: predicated region fallthrough
CT: control target
= control target key end

     0   :  { %v2979_v7 = vmov 0.0   ;;  %s4474_s0 = inlined_call_operand.vmem [shape: f32[2,128,384], index: 0, kind: input, shape index: {}]   ;;  %s4475_s1 = inlined_call_operand.vmem [shape: f32[384,192], index: 1, kind: input, shape index: {}]   ;;  %s4476_s2 = inlined_call_operand.hbm [shape: f32[128,128], index: 2, kind: output, shape index: {}]  }
   0x1   :  { %v109_v0 = vld [vmem:[%s4475_s1 + $0x8] sm:$0xff]  ;;  %v111_v1 = vld [vmem:[%s4475_s1 + $0x18] sm:$0xff]  ;;  %v108_v2 = vld [vmem:[%s4475_s1] sm:$0xff]  ;;  %621 = vmatprep.mubr.f32.mxu1 %v2979_v7 }
   0x2   :  { %v2406_v3 = vpack.c.bf16 %v111_v1, %v109_v0  ;;  %v110_v4 = vld [vmem:[%s4475_s1 + $0x10] sm:$0xff]  ;;  %v113_v5 = vld [vmem:[%s4475_s1 + $0x28] sm:$0xff]  ;;  %v115_v6 = vld [vmem:[%s4475_s1 + $0x38] sm:$0xff] }
   0x3   :  { %v2408_v8 = vpack.c.bf16 %v110_v4, %v108_v2  ;;  %v2410_v9 = vpack.c.bf16 %v115_v6, %v113_v5  ;;  %v112_v10 = vld [vmem:[%s4475_s1 + $0x20] sm:$0xff]  ;;  %v114_v11 = vld [vmem:[%s4475_s1 + $0x30] sm:$0xff]  ;;  %v117_v12 = vld [vmem:[%s4475_s1 + $0x48] sm:$0xff] }
   0x4   :  { %2407 = vmatprep.subr.bf16.mxu0 %v2406_v3  ;;  %v119_v13 = vld [vmem:[%s4475_s1 + $0x58] sm:$0xff]  ;;  %v2412_v14 = vpack.c.bf16 %v114_v11, %v112_v10  ;;  %v116_v16 = vld [vmem:[%s4475_s1 + $0x40] sm:$0xff]  ;;  %v118_v17 = vld [vmem:[%s4475_s1 + $0x50] sm:$0xff] }
   0x5   :  { %2409 = vmatpush1.bf16.msra.mxu0 %v2408_v8  ;;  %v2414_v15 = vpack.c.bf16 %v119_v13, %v117_v12  ;;  %v121_v18 = vld [vmem:[%s4475_s1 + $0x68] sm:$0xff]  ;;  %v123_v19 = vld [vmem:[%s4475_s1 + $0x78] sm:$0xff]  ;;  %v2416_v20 = vpack.c.bf16 %v118_v17, %v116_v16  ;;  %v120_v22 = vld [vmem:[%s4475_s1 + $0x60] sm:$0xff] }
   0x6   :  { %2411 = vmatprep.subr.bf16.mxu0 %v2410_v9  ;;  %v2418_v21 = vpack.c.bf16 %v123_v19, %v121_v18  ;;  %v122_v23 = vld [vmem:[%s4475_s1 + $0x70] sm:$0xff]  ;;  %v125_v24 = vld [vmem:[%s4475_s1 + $0x88] sm:$0xff]  ;;  %v127_v25 = vld [vmem:[%s4475_s1 + $0x98] sm:$0xff] }
   0x7   :  { %v2420_v26 = vpack.c.bf16 %v122_v23, %v120_v22  ;;  %v2422_v27 = vpack.c.bf16 %v127_v25, %v125_v24  ;;  %v124_v28 = vld [vmem:[%s4475_s1 + $0x80] sm:$0xff]  ;;  %v126_v29 = vld [vmem:[%s4475_s1 + $0x90] sm:$0xff]  ;;  %v129_v30 = vld [vmem:[%s4475_s1 + $0xa8] sm:$0xff] }
   0x8   :  { %v131_v31 = vld [vmem:[%s4475_s1 + $0xb8] sm:$0xff]  ;;  %v2424_v32 = vpack.c.bf16 %v126_v29, %v124_v28  ;;  %v128_v34 = vld [vmem:[%s4475_s1 + $0xa0] sm:$0xff]  ;;  %v130_v35 = vld [vmem:[%s4475_s1 + $0xb0] sm:$0xff] }
   0x9   :  { %2413 = vmatpush1.bf16.msra.mxu0 %v2412_v14  ;;  %v2426_v33 = vpack.c.bf16 %v131_v31, %v129_v30  ;;  %v133_v36 = vld [vmem:[%s4475_s1 + $0xc8] sm:$0xff]  ;;  %v135_v37 = vld [vmem:[%s4475_s1 + $0xd8] sm:$0xff]  ;;  %v2428_v38 = vpack.c.bf16 %v130_v35, %v128_v34  ;;  %v132_v39 = vld [vmem:[%s4475_s1 + $0xc0] sm:$0xff] }
   0xa   :  { %2415 = vmatprep.subr.bf16.mxu0 %v2414_v15  ;;  %v134_v40 = vld [vmem:[%s4475_s1 + $0xd0] sm:$0xff]  ;;  %v2430_v41 = vpack.c.bf16 %v135_v37, %v133_v36  ;;  %v137_v42 = vld [vmem:[%s4475_s1 + $0xe8] sm:$0xff]  ;;  %v139_v43 = vld [vmem:[%s4475_s1 + $0xf8] sm:$0xff] }
   0xb   :  { %v13_v44 = vld [vmem:[%s4474_s0 + $0x8] sm:$0xff]  ;;  %v175_v46 = vld [vmem:[%s4475_s1 + $0x218] sm:$0xff]  ;;  %v172_v47 = vld [vmem:[%s4475_s1 + $0x200] sm:$0xff]  ;;  %v2432_v50 = vpack.c.bf16 %v134_v40, %v132_v39  ;;  %v2434_v53 = vpack.c.bf16 %v139_v43, %v137_v42 }
   0xc   :  { %268 = vmatprep.mubr.f32.mxu0 %v13_v44  ;;  %v173_v45 = vld [vmem:[%s4475_s1 + $0x208] sm:$0xff]  ;;  %v174_v49 = vld [vmem:[%s4475_s1 + $0x210] sm:$0xff]  ;;  %v136_v51 = vld [vmem:[%s4475_s1 + $0xe0] sm:$0xff] }
   0xd   :  { %2417 = vmatpush1.bf16.msra.mxu0 %v2416_v20  ;;  %v3102_v48 = vpack.c.bf16 %v175_v46, %v173_v45  ;;  %v3110_v52 = vpack.c.bf16 %v174_v49, %v172_v47  ;;  %v138_v54 = vld [vmem:[%s4475_s1 + $0xf0] sm:$0xff]  ;;  %v141_v55 = vld [vmem:[%s4475_s1 + $0x108] sm:$0xff]  ;;  %v143_v56 = vld [vmem:[%s4475_s1 + $0x118] sm:$0xff] }
   0xe   :  { %2419 = vmatprep.subr.bf16.mxu0 %v2418_v21  ;;  %v177_v57 = vld [vmem:[%s4475_s1 + $0x228] sm:$0xff]  ;;  %v179_v58 = vld [vmem:[%s4475_s1 + $0x238] sm:$0xff]  ;;  %v176_v59 = vld [vmem:[%s4475_s1 + $0x220] sm:$0xff]  ;;  %v2436_v62 = vpack.c.bf16 %v138_v54, %v136_v51  ;;  %v2438_v1 = vpack.c.bf16 %v143_v56, %v141_v55 }
   0xf   :  { %2662 = vmatprep.subr.bf16.mxu1 %v3102_v48  ;;  %v3132_v60 = vpack.c.bf16 %v179_v58, %v177_v57  ;;  %v178_v61 = vld [vmem:[%s4475_s1 + $0x230] sm:$0xff]  ;;  %v140_v63 = vld [vmem:[%s4475_s1 + $0x100] sm:$0xff]  ;;  %v145_v3 = vld [vmem:[%s4475_s1 + $0x128] sm:$0xff] }
  0x10   :  { %2670 = vmatpush1.bf16.msra.mxu1 %v3110_v52  ;;  %v3140_v0 = vpack.c.bf16 %v178_v61, %v176_v59  ;;  %v142_v2 = vld [vmem:[%s4475_s1 + $0x110] sm:$0xff]  ;;  %v147_v4 = vld [vmem:[%s4475_s1 + $0x138] sm:$0xff]  ;;  %v181_v5 = vld [vmem:[%s4475_s1 + $0x248] sm:$0xff] }
  0x11   :  { %2421 = vmatpush1.bf16.msra.mxu0 %v2420_v26  ;;  %2663 = vmatprep.subr.bf16.mxu1 %v3132_v60  ;;  %v183_v6 = vld [vmem:[%s4475_s1 + $0x258] sm:$0xff]  ;;  %v180_v8 = vld [vmem:[%s4475_s1 + $0x240] sm:$0xff]  ;;  %v182_v10 = vld [vmem:[%s4475_s1 + $0x250] sm:$0xff]  ;;  %v2440_v11 = vpack.c.bf16 %v142_v2, %v140_v63  ;;  %v2442_v15 = vpack.c.bf16 %v147_v4, %v145_v3 }
  0x12   :  { %2423 = vmatprep.subr.bf16.mxu0 %v2422_v27  ;;  %v3162_v9 = vpack.c.bf16 %v183_v6, %v181_v5  ;;  %v144_v12 = vld [vmem:[%s4475_s1 + $0x120] sm:$0xff]  ;;  %v146_v13 = vld [vmem:[%s4475_s1 + $0x130] sm:$0xff]  ;;  %v3173_v14 = vpack.c.bf16 %v182_v10, %v180_v8  ;;  %v149_v16 = vld [vmem:[%s4475_s1 + $0x148] sm:$0xff] }
  0x13   :  { %v185_v17 = vld [vmem:[%s4475_s1 + $0x268] sm:$0xff]  ;;  %v187_v18 = vld [vmem:[%s4475_s1 + $0x278] sm:$0xff]  ;;  %v184_v21 = vld [vmem:[%s4475_s1 + $0x260] sm:$0xff]  ;;  %v2444_v26 = vpack.c.bf16 %v146_v13, %v144_v12 }
  0x14   :  { %2671 = vmatpush1.bf16.msra.mxu1 %v3140_v0  ;;  %v151_v19 = vld [vmem:[%s4475_s1 + $0x158] sm:$0xff]  ;;  %v3189_v20 = vpack.c.bf16 %v187_v18, %v185_v17  ;;  %v186_v22 = vld [vmem:[%s4475_s1 + $0x270] sm:$0xff]  ;;  %v189_v24 = vld [vmem:[%s4475_s1 + $0x288] sm:$0xff] }
  0x15   :  { %2425 = vmatpush1.bf16.msra.mxu0 %v2424_v32  ;;  %2664 = vmatprep.subr.bf16.mxu1 %v3162_v9  ;;  %v3197_v23 = vpack.c.bf16 %v186_v22, %v184_v21  ;;  %v191_v25 = vld [vmem:[%s4475_s1 + $0x298] sm:$0xff]  ;;  %v148_v27 = vld [vmem:[%s4475_s1 + $0x140] sm:$0xff]  ;;  %v190_v30 = vld [vmem:[%s4475_s1 + $0x290] sm:$0xff]  ;;  %v2446_v31 = vpack.c.bf16 %v151_v19, %v149_v16 }
  0x16   :  { %2427 = vmatprep.subr.bf16.mxu0 %v2426_v33  ;;  %v3209_v28 = vpack.c.bf16 %v191_v25, %v189_v24  ;;  %v188_v29 = vld [vmem:[%s4475_s1 + $0x280] sm:$0xff]  ;;  %v150_v32 = vld [vmem:[%s4475_s1 + $0x150] sm:$0xff]  ;;  %v193_v33 = vld [vmem:[%s4475_s1 + $0x2a8] sm:$0xff] }
  0x17   :  { %v195_v34 = vld [vmem:[%s4475_s1 + $0x2b8] sm:$0xff]  ;;  %v153_v35 = vld [vmem:[%s4475_s1 + $0x168] sm:$0xff]  ;;  %v3233_v37 = vpack.c.bf16 %v190_v30, %v188_v29  ;;  %v192_v39 = vld [vmem:[%s4475_s1 + $0x2a0] sm:$0xff] }
  0x18   :  { %2672 = vmatpush1.bf16.msra.mxu1 %v3173_v14  ;;  %v155_v36 = vld [vmem:[%s4475_s1 + $0x178] sm:$0xff]  ;;  %v194_v40 = vld [vmem:[%s4475_s1 + $0x2b0] sm:$0xff]  ;;  %v197_v42 = vld [vmem:[%s4475_s1 + $0x2c8] sm:$0xff] }
  0x19   :  { %2429 = vmatpush1.bf16.msra.mxu0 %v2428_v38  ;;  %2665 = vmatprep.subr.bf16.mxu1 %v3189_v20  ;;  %v3236_v38 = vpack.c.bf16 %v195_v34, %v193_v33  ;;  %v199_v43 = vld [vmem:[%s4475_s1 + $0x2d8] sm:$0xff]  ;;  %v2450_v44 = vpack.c.bf16 %v155_v36, %v153_v35  ;;  %v152_v45 = vld [vmem:[%s4475_s1 + $0x160] sm:$0xff]  ;;  %v154_v46 = vld [vmem:[%s4475_s1 + $0x170] sm:$0xff] }
  0x1a   :  { %2431 = vmatprep.subr.bf16.mxu0 %v2430_v41  ;;  %v2448_v41 = vpack.c.bf16 %v150_v32, %v148_v27  ;;  %v157_v47 = vld [vmem:[%s4475_s1 + $0x188] sm:$0xff]  ;;  %v159_v49 = vld [vmem:[%s4475_s1 + $0x198] sm:$0xff]  ;;  %v3266_v51 = vpack.c.bf16 %v199_v43, %v197_v42  ;;  %v198_v54 = vld [vmem:[%s4475_s1 + $0x2d0] sm:$0xff]  ;;  %v2452_v55 = vpack.c.bf16 %v154_v46, %v152_v45 }
  0x1b   :  { %v201_v56 = vld [vmem:[%s4475_s1 + $0x2e8] sm:$0xff]  ;;  %v203_v57 = vld [vmem:[%s4475_s1 + $0x2f8] sm:$0xff]  ;;  %v2454_v58 = vpack.c.bf16 %v159_v49, %v157_v47  ;;  %v156_v59 = vld [vmem:[%s4475_s1 + $0x180] sm:$0xff] }
  0x1c   :  { %2673 = vmatpush1.bf16.msra.mxu1 %v3197_v23  ;;  %v158_v61 = vld [vmem:[%s4475_s1 + $0x190] sm:$0xff]  ;;  %v163_v63 = vld [vmem:[%s4475_s1 + $0x1b8] sm:$0xff]  ;;  %v3296_v2 = vpack.c.bf16 %v203_v57, %v201_v56  ;;  %v200_v3 = vld [vmem:[%s4475_s1 + $0x2e0] sm:$0xff] }
  0x1d   :  { %2433 = vmatpush1.bf16.msra.mxu0 %v2432_v50  ;;  %2666 = vmatprep.subr.bf16.mxu1 %v3209_v28  ;;  %v3263_v50 = vpack.c.bf16 %v194_v40, %v192_v39  ;;  %v202_v4 = vld [vmem:[%s4475_s1 + $0x2f0] sm:$0xff]  ;;  %v2456_v5 = vpack.c.bf16 %v158_v61, %v156_v59  ;;  %v160_v8 = vld [vmem:[%s4475_s1 + $0x1a0] sm:$0xff]  ;;  %v167_v12 = vld [vmem:[%s4475_s1 + $0x1d8] sm:$0xff] }
  0x1e   :  { %2435 = vmatprep.subr.bf16.mxu0 %v2434_v53  ;;  %v196_v53 = vld [vmem:[%s4475_s1 + $0x2c0] sm:$0xff]  ;;  %v162_v10 = vld [vmem:[%s4475_s1 + $0x1b0] sm:$0xff]  ;;  %v3317_v13 = vpack.c.bf16 %v202_v4, %v200_v3  ;;  %v169_v19 = vld [vmem:[%s4475_s1 + $0x1e8] sm:$0xff] }
  0x1f   :  { %v164_v17 = vld [vmem:[%s4475_s1 + $0x1c0] sm:$0xff]  ;;  %v166_v18 = vld [vmem:[%s4475_s1 + $0x1d0] sm:$0xff]  ;;  %v171_v21 = vld [vmem:[%s4475_s1 + $0x1f8] sm:$0xff] }
  0x20   :  { %2674 = vmatpush1.bf16.msra.mxu1 %v3233_v37  ;;  %v62_v22 = vld [vmem:[%s4474_s0 + $0x190] sm:$0xff]  ;;  %v2464_v24 = vpack.c.bf16 %v166_v18, %v164_v17  ;;  %v2466_v25 = vpack.c.bf16 %v171_v21, %v169_v19 }
  0x21   :  { %2437 = vmatpush1.bf16.msra.mxu0 %v2436_v62  ;;  %2667 = vmatprep.subr.bf16.mxu1 %v3236_v38  ;;  %v161_v62 = vld [vmem:[%s4475_s1 + $0x1a8] sm:$0xff]  ;;  %v170_v27 = vld [vmem:[%s4475_s1 + $0x1f0] sm:$0xff] }
  0x22   :  { %2439 = vmatprep.subr.bf16.mxu0 %v2438_v1  ;;  %v3293_v1 = vpack.c.bf16 %v198_v54, %v196_v53  ;;  %v2458_v6 = vpack.c.bf16 %v163_v63, %v161_v62 }
  0x24   :  { %2675 = vmatpush1.bf16.msra.mxu1 %v3263_v50 }
  0x25   :  { %2441 = vmatpush1.bf16.msra.mxu0 %v2440_v11  ;;  %2668 = vmatprep.subr.bf16.mxu1 %v3266_v51  ;;  %v165_v11 = vld [vmem:[%s4475_s1 + $0x1c8] sm:$0xff] }
  0x26   :  { %2443 = vmatprep.subr.bf16.mxu0 %v2442_v15  ;;  %v2460_v15 = vpack.c.bf16 %v162_v10, %v160_v8  ;;  %v2462_v16 = vpack.c.bf16 %v167_v12, %v165_v11 }
  0x28   :  { %2676 = vmatpush1.bf16.msra.mxu1 %v3293_v1 }
  0x29   :  { %2445 = vmatpush1.bf16.msra.mxu0 %v2444_v26  ;;  %2669 = vmatprep.subr.bf16.mxu1 %v3296_v2  ;;  %v168_v26 = vld [vmem:[%s4475_s1 + $0x1e0] sm:$0xff] }
  0x2a   :  { %2447 = vmatprep.subr.bf16.mxu0 %v2446_v31 }
  0x2c   :  { %2677 = vmatpush1.bf16.msra.mxu1 %v3317_v13 }
  0x2d   :  { %2449 = vmatpush1.bf16.msra.mxu0 %v2448_v41 }
  0x2e   :  { %2451 = vmatprep.subr.bf16.mxu0 %v2450_v44 }
  0x2f   :  { %622 = vmatmul.mubr.f32.vlgmr.msra.gmra.mrb[0].mxu1 %v62_v22 }
  0x31   :  { %2453 = vmatpush1.bf16.msra.mxu0 %v2452_v55 }
  0x32   :  { %2455 = vmatprep.subr.bf16.mxu0 %v2454_v58 }
  0x35   :  { %2457 = vmatpush1.bf16.msra.mxu0 %v2456_v5 }
  0x36   :  { %2459 = vmatprep.subr.bf16.mxu0 %v2458_v6 }
  0x39   :  { %2461 = vmatpush1.bf16.msra.mxu0 %v2460_v15 }
  0x3a   :  { %2463 = vmatprep.subr.bf16.mxu0 %v2462_v16 }
  0x3b   :  { %7 = vsyncpa [#allocation3], 0  ;;  %627 = vmatprep.mubr.f32.mxu1 %v2979_v7  ;;  %v65_v29 = vld [vmem:[%s4474_s0 + $0x1a8] sm:$0xff]  ;;  %v2468_v30 = vpack.c.bf16 %v170_v27, %v168_v26  ;;  %v68_v31 = vld [vmem:[%s4474_s0 + $0x1c0] sm:$0xff]  ;;  %vm801_vm0 = vcmask 523264   ;;  %s2981_s22 = smov [#allocation2]  }
  0x3c   :  { %628 = vmatmul.mubr.f32.gmra.mrb[2].mxu1 %v65_v29  ;;  %v12_v32 = vld [vmem:[%s4474_s0] sm:$0xff]  ;;  %v71_v34 = vld [vmem:[%s4474_s0 + $0x1d8] sm:$0xff]  ;;  %v74_v36 = vld [vmem:[%s4474_s0 + $0x1f0] sm:$0xff]  ;;  %s1979_s23 = sshll.u32 %s2981_s22, 4  ;;  %s1980_s23 = int_to_ptr.vmem [resolvable:$true] %s1979_s23 }
  0x3d   :  { %2465 = vmatpush1.bf16.msra.mxu0 %v2464_v24  ;;  %633 = vmatprep.mubr.f32.mxu1 %v2979_v7  ;;  %v16_v33 = vld [vmem:[%s4474_s0 + $0x20] sm:$0xff]  ;;  %v15_v35 = vld [vmem:[%s4474_s0 + $0x18] sm:$0xff]  ;;  %v22_v39 = vld [vmem:[%s4474_s0 + $0x50] sm:$0xff]  ;;  %s2955_s24 = scalar_lea.vmem %s1980_s23, 2048  ;;  %p2960_p1 = scmp.lt.s32.totalorder %s1980_s23, %s1980_s23 }
  0x3e   :  { %2467 = vmatprep.subr.bf16.mxu0 %v2466_v25  ;;  %v21_v40 = vld [vmem:[%s4474_s0 + $0x48] sm:$0xff]  ;;  %v24_v41 = vld [vmem:[%s4474_s0 + $0x60] sm:$0xff]  ;;  %v27_v42 = vld [vmem:[%s4474_s0 + $0x78] sm:$0xff]  ;;  %p2956_p0 = scmp.ne.s32.totalorder %s1980_s23, %s2955_s24  ;;  %p2961_p2 = scmp.lt.s32.totalorder %s2955_s24, %s2955_s24 }
  0x3f   :  { %v30_v43 = vld [vmem:[%s4474_s0 + $0x90] sm:$0xff]  ;;  %v33_v44 = vld [vmem:[%s4474_s0 + $0xa8] sm:$0xff]  ;;  %v92_v46 = vld [vmem:[%s4474_s0 + $0x280] sm:$0xff] }
  0x40   :  { %634 = vmatmul.mubr.f32.gmra.mrb[4].mxu1 %v68_v31  ;;  %v37_v45 = vld [vmem:[%s4474_s0 + $0xc8] sm:$0xff]  ;;  %v36_v47 = vld [vmem:[%s4474_s0 + $0xc0] sm:$0xff]  ;;  %v43_v53 = vld [vmem:[%s4474_s0 + $0xf8] sm:$0xff]  ;;  %p2962_p3 = por %p2961_p2, %p2960_p1 }
  0x41   :  { %2469 = vmatpush1.bf16.msra.mxu0 %v2468_v30  ;;  %639 = vmatprep.mubr.f32.mxu1 %v2979_v7  ;;  %v40_v49 = vld [vmem:[%s4474_s0 + $0xe0] sm:$0xff]  ;;  %v98_v54 = vld [vmem:[%s4474_s0 + $0x2b0] sm:$0xff]  ;;  %v101_v57 = vld [vmem:[%s4474_s0 + $0x2c8] sm:$0xff] }
  0x42   :  { %2471 = vmatprep.subr.bf16.mxu0 %v3102_v48  ;;  %v19_v48 = vld [vmem:[%s4474_s0 + $0x38] sm:$0xff]  ;;  %v42_v55 = vld [vmem:[%s4474_s0 + $0xf0] sm:$0xff]  ;;  %v45_v58 = vld [vmem:[%s4474_s0 + $0x108] sm:$0xff]  ;;  %p2963_p4 = pnand %p2962_p3, %p2956_p0 }
  0x43   :  { %v46_v56 = vld [vmem:[%s4474_s0 + $0x110] sm:$0xff]  ;;  %v49_v59 = vld [vmem:[%s4474_s0 + $0x128] sm:$0xff]  ;;  %v104_v61 = vld [vmem:[%s4474_s0 + $0x2e0] sm:$0xff] }
  0x44   :  { %269 = vmatmul.mubr.f32.vlgmr.msra.gmra.mrb[0].mxu0 %v12_v32  ;;  %640 = vmatmul.mubr.f32.gmra.mrb[6].mxu1 %v71_v34  ;;  %v48_v62 = vld [vmem:[%s4474_s0 + $0x120] sm:$0xff]  ;;  %v55_v3 = vld [vmem:[%s4474_s0 + $0x158] sm:$0xff]  ;;  %v54_v4 = vld [vmem:[%s4474_s0 + $0x150] sm:$0xff] }
  0x45   :  { %2473 = vmatpush1.bf16.msra.mxu0 %v3110_v52  ;;  %274 = vmatprep.mubr.f32.mxu0 %v16_v33  ;;  %v18_v52 = vld [vmem:[%s4474_s0 + $0x30] sm:$0xff]  ;;  %v52_v63 = vld [vmem:[%s4474_s0 + $0x140] sm:$0xff]  ;;  %v57_v6 = vld [vmem:[%s4474_s0 + $0x168] sm:$0xff] }
  0x46   :  { %2475 = vmatprep.subr.bf16.mxu0 %v3132_v60  ;;  %645 = vmatprep.mubr.f32.mxu1 %v2979_v7  ;;  %v77_v60 = vld [vmem:[%s4474_s0 + $0x208] sm:$0xff]  ;;  %v58_v5 = vld [vmem:[%s4474_s0 + $0x170] sm:$0xff]  ;;  %v60_v10 = vld [vmem:[%s4474_s0 + $0x180] sm:$0xff] }
  0x47   :  { %v61_v8 = vld [vmem:[%s4474_s0 + $0x188] sm:$0xff]  ;;  %v64_v11 = vld [vmem:[%s4474_s0 + $0x1a0] sm:$0xff]  ;;  %v63_v12 = vld [vmem:[%s4474_s0 + $0x198] sm:$0xff] }
  0x48   :  { %275 = vmatmul.mubr.f32.gmra.mrb[2].mxu0 %v15_v35  ;;  %646 = vmatmul.mubr.f32.gmra.mrb[8].mxu1 %v74_v36  ;;  %v66_v15 = vld [vmem:[%s4474_s0 + $0x1b0] sm:$0xff]  ;;  %v69_v17 = vld [vmem:[%s4474_s0 + $0x1c8] sm:$0xff]  ;;  %v72_v19 = vld [vmem:[%s4474_s0 + $0x1e0] sm:$0xff] }
  0x49   :  { %280 = vmatprep.mubr.f32.mxu0 %v19_v48  ;;  %2477 = vmatpush1.bf16.msra.mxu0 %v3140_v0  ;;  %v25_v0 = vld [vmem:[%s4474_s0 + $0x68] sm:$0xff]  ;;  %v70_v16 = vld [vmem:[%s4474_s0 + $0x1d0] sm:$0xff]  ;;  %v76_v21 = vld [vmem:[%s4474_s0 + $0x200] sm:$0xff] }
  0x4a   :  { %2479 = vmatprep.subr.bf16.mxu0 %v3162_v9  ;;  %651 = vmatprep.mubr.f32.mxu1 %v2979_v7  ;;  %v80_v9 = vld [vmem:[%s4474_s0 + $0x220] sm:$0xff]  ;;  %v73_v18 = vld [vmem:[%s4474_s0 + $0x1e8] sm:$0xff]  ;;  %v75_v22 = vld [vmem:[%s4474_s0 + $0x1f8] sm:$0xff] }
  0x4b   :  { %v79_v24 = vld [vmem:[%s4474_s0 + $0x218] sm:$0xff]  ;;  %v78_v25 = vld [vmem:[%s4474_s0 + $0x210] sm:$0xff]  ;;  %v81_v27 = vld [vmem:[%s4474_s0 + $0x228] sm:$0xff] }
  0x4c   :  { %281 = vmatmul.mubr.f32.gmra.mrb[4].mxu0 %v18_v52  ;;  %652 = vmatmul.mubr.f32.gmra.mrb[10].mxu1 %v77_v60  ;;  %v82_v26 = vld [vmem:[%s4474_s0 + $0x230] sm:$0xff]  ;;  %v85_v29 = vld [vmem:[%s4474_s0 + $0x248] sm:$0xff]  ;;  %v84_v30 = vld [vmem:[%s4474_s0 + $0x240] sm:$0xff] }
  0x4d   :  { %286 = vmatprep.mubr.f32.mxu0 %v22_v39  ;;  %2481 = vmatpush1.bf16.msra.mxu0 %v3173_v14  ;;  %v28_v14 = vld [vmem:[%s4474_s0 + $0x80] sm:$0xff]  ;;  %v87_v32 = vld [vmem:[%s4474_s0 + $0x258] sm:$0xff]  ;;  %v90_v34 = vld [vmem:[%s4474_s0 + $0x270] sm:$0xff] }
  0x4e   :  { %2483 = vmatprep.subr.bf16.mxu0 %v3189_v20  ;;  %657 = vmatprep.mubr.f32.mxu1 %v2979_v7  ;;  %v83_v20 = vld [vmem:[%s4474_s0 + $0x238] sm:$0xff]  ;;  %v88_v31 = vld [vmem:[%s4474_s0 + $0x260] sm:$0xff]  ;;  %v94_v35 = vld [vmem:[%s4474_s0 + $0x290] sm:$0xff] }
  0x4f   :  { %v91_v33 = vld [vmem:[%s4474_s0 + $0x278] sm:$0xff]  ;;  %v93_v48 = vld [vmem:[%s4474_s0 + $0x288] sm:$0xff]  ;;  %v96_v52 = vld [vmem:[%s4474_s0 + $0x2a0] sm:$0xff] }
  0x50   :  { %287 = vmatmul.mubr.f32.gmra.mrb[6].mxu0 %v21_v40  ;;  %658 = vmatmul.mubr.f32.gmra.mrb[12].mxu1 %v80_v9  ;;  %v97_v36 = vld [vmem:[%s4474_s0 + $0x2a8] sm:$0xff]  ;;  %v100_v39 = vld [vmem:[%s4474_s0 + $0x2c0] sm:$0xff]  ;;  %v99_v60 = vld [vmem:[%s4474_s0 + $0x2b8] sm:$0xff] }
  0x51   :  { %292 = vmatprep.mubr.f32.mxu0 %v25_v0  ;;  %2485 = vmatpush1.bf16.msra.mxu0 %v3197_v23  ;;  %v31_v23 = vld [vmem:[%s4474_s0 + $0x98] sm:$0xff]  ;;  %v102_v0 = vld [vmem:[%s4474_s0 + $0x2d0] sm:$0xff]  ;;  %vm3818_vm1 = vmpackc.low %vm801_vm0, %vm801_vm0 }
  0x52   :  { %2487 = vmatprep.subr.bf16.mxu0 %v3209_v28  ;;  %663 = vmatprep.mubr.f32.mxu1 %v2979_v7  ;;  %v86_v28 = vld [vmem:[%s4474_s0 + $0x250] sm:$0xff]  ;;  %v103_v40 = vld [vmem:[%s4474_s0 + $0x2d8] sm:$0xff] }
  0x53   :  { %v106_v9 = vld [vmem:[%s4474_s0 + $0x2f0] sm:$0xff] }
  0x54   :  { %293 = vmatmul.mubr.f32.gmra.mrb[8].mxu0 %v24_v41  ;;  %664 = vmatmul.mubr.f32.gmra.mrb[14].mxu1 %v83_v20  ;;  %v105_v41 = vld [vmem:[%s4474_s0 + $0x2e8] sm:$0xff] }
  0x55   :  { %298 = vmatprep.mubr.f32.mxu0 %v28_v14  ;;  %2489 = vmatpush1.bf16.msra.mxu0 %v3233_v37  ;;  %v34_v37 = vld [vmem:[%s4474_s0 + $0xb0] sm:$0xff]  ;;  %v17_v20 = vld [vmem:[%s4474_s0 + $0x28] sm:$0xff] }
  0x56   :  { %2491 = vmatprep.subr.bf16.mxu0 %v3236_v38  ;;  %669 = vmatprep.mubr.f32.mxu1 %v2979_v7  ;;  %v89_v38 = vld [vmem:[%s4474_s0 + $0x268] sm:$0xff]  ;;  %v14_v14 = vld [vmem:[%s4474_s0 + $0x10] sm:$0xff] }
  0x58   :  { %299 = vmatmul.mubr.f32.gmra.mrb[10].mxu0 %v27_v42  ;;  %670 = vmatmul.mubr.f32.gmra.mrb[16].mxu1 %v86_v28  ;;  %v20_v42 = vld [vmem:[%s4474_s0 + $0x40] sm:$0xff]  ;;  %v26_v28 = vld [vmem:[%s4474_s0 + $0x70] sm:$0xff] }
  0x59   :  { %304 = vmatprep.mubr.f32.mxu0 %v31_v23  ;;  %2493 = vmatpush1.bf16.msra.mxu0 %v3263_v50  ;;  %v95_v50 = vld [vmem:[%s4474_s0 + $0x298] sm:$0xff] }
  0x5a   :  { %2495 = vmatprep.subr.bf16.mxu0 %v3266_v51  ;;  %675 = vmatprep.mubr.f32.mxu1 %v2979_v7  ;;  %v39_v51 = vld [vmem:[%s4474_s0 + $0xd8] sm:$0xff] }
  0x5b   :  { %v23_v23 = vld [vmem:[%s4474_s0 + $0x58] sm:$0xff] }
  0x5c   :  { %305 = vmatmul.mubr.f32.gmra.mrb[12].mxu0 %v30_v43  ;;  %676 = vmatmul.mubr.f32.gmra.mrb[18].mxu1 %v89_v38  ;;  %v29_v43 = vld [vmem:[%s4474_s0 + $0x88] sm:$0xff]  ;;  %v35_v38 = vld [vmem:[%s4474_s0 + $0xb8] sm:$0xff] }
  0x5d   :  { %310 = vmatprep.mubr.f32.mxu0 %v34_v37  ;;  %2497 = vmatpush1.bf16.msra.mxu0 %v3293_v1  ;;  %v107_v1 = vld [vmem:[%s4474_s0 + $0x2f8] sm:$0xff]  ;;  %v32_v37 = vld [vmem:[%s4474_s0 + $0xa0] sm:$0xff] }
  0x5e   :  { %2499 = vmatprep.subr.bf16.mxu0 %v3296_v2  ;;  %681 = vmatprep.mubr.f32.mxu1 %v2979_v7  ;;  %v51_v2 = vld [vmem:[%s4474_s0 + $0x138] sm:$0xff] }
  0x60   :  { %311 = vmatmul.mubr.f32.gmra.mrb[14].mxu0 %v33_v44  ;;  %682 = vmatmul.mubr.f32.gmra.mrb[20].mxu1 %v92_v46  ;;  %v38_v44 = vld [vmem:[%s4474_s0 + $0xd0] sm:$0xff]  ;;  %v44_v46 = vld [vmem:[%s4474_s0 + $0x100] sm:$0xff] }
  0x61   :  { %316 = vmatprep.mubr.f32.mxu0 %v37_v45  ;;  %2501 = vmatpush1.bf16.msra.mxu0 %v3317_v13  ;;  %v67_v13 = vld [vmem:[%s4474_s0 + $0x1b8] sm:$0xff]  ;;  %v41_v45 = vld [vmem:[%s4474_s0 + $0xe8] sm:$0xff] }
  0x62   :  { %687 = vmatprep.mubr.f32.mxu1 %v2979_v7 }
  0x64   :  { %317 = vmatmul.mubr.f32.gmra.mrb[16].mxu0 %v36_v47  ;;  %688 = vmatmul.mubr.f32.gmra.mrb[22].mxu1 %v95_v50  ;;  %v47_v47 = vld [vmem:[%s4474_s0 + $0x118] sm:$0xff]  ;;  %v53_v50 = vld [vmem:[%s4474_s0 + $0x148] sm:$0xff] }
  0x65   :  { %322 = vmatprep.mubr.f32.mxu0 %v40_v49  ;;  %693 = vmatprep.mubr.f32.mxu1 %v2979_v7  ;;  %v50_v49 = vld [vmem:[%s4474_s0 + $0x130] sm:$0xff] }
  0x68   :  { %323 = vmatmul.mubr.f32.gmra.mrb[18].mxu0 %v39_v51  ;;  %694 = vmatmul.mubr.f32.gmra.mrb[24].mxu1 %v98_v54  ;;  %v56_v51 = vld [vmem:[%s4474_s0 + $0x160] sm:$0xff] }
  0x69   :  { %328 = vmatprep.mubr.f32.mxu0 %v43_v53  ;;  %699 = vmatprep.mubr.f32.mxu1 %v2979_v7  ;;  %v59_v53 = vld [vmem:[%s4474_s0 + $0x178] sm:$0xff]  ;;  %s2980_s0 = smov 64  }
  0x6c   :  { %329 = vmatmul.mubr.f32.gmra.mrb[20].mxu0 %v42_v55  ;;  %700 = vmatmul.mubr.f32.gmra.mrb[26].mxu1 %v101_v57 }
  0x6d   :  { %334 = vmatprep.mubr.f32.mxu0 %v46_v56  ;;  %705 = vmatprep.mubr.f32.mxu1 %v2979_v7 }
  0x70   :  { %335 = vmatmul.mubr.f32.gmra.mrb[22].mxu0 %v45_v58  ;;  %706 = vmatmul.mubr.f32.gmra.mrb[28].mxu1 %v104_v61 }
  0x71   :  { %340 = vmatprep.mubr.f32.mxu0 %v49_v59  ;;  %711 = vmatprep.mubr.f32.mxu1 %v2979_v7 }
  0x74   :  { %341 = vmatmul.mubr.f32.gmra.mrb[24].mxu0 %v48_v62  ;;  %712 = vmatmul.mubr.f32.gmra.mrb[30].mxu1 %v107_v1 }
  0x75   :  { %346 = vmatprep.mubr.f32.mxu0 %v52_v63 }
  0x78   :  { %347 = vmatmul.mubr.f32.gmra.mrb[26].mxu0 %v51_v2 }
  0x79   :  { %352 = vmatprep.mubr.f32.mxu0 %v55_v3 }
  0x7c   :  { %353 = vmatmul.mubr.f32.gmra.mrb[28].mxu0 %v54_v4 }
  0x7d   :  { %358 = vmatprep.mubr.f32.mxu0 %v58_v5 }
  0x80   :  { %359 = vmatmul.mubr.f32.gmra.mrb[30].mxu0 %v57_v6 }
  0x81   :  { %364 = vmatprep.mubr.f32.mxu0 %v61_v8 }
  0x84   :  { %365 = vmatmul.mubr.f32.gmra.mrb[32].mxu0 %v60_v10 }
  0x85   :  { %370 = vmatprep.mubr.f32.mxu0 %v64_v11 }
  0x88   :  { %371 = vmatmul.mubr.f32.gmra.mrb[34].mxu0 %v63_v12 }
  0x89   :  { %376 = vmatprep.mubr.f32.mxu0 %v67_v13 }
  0x8c   :  { %377 = vmatmul.mubr.f32.gmra.mrb[36].mxu0 %v66_v15 }
  0x8d   :  { %382 = vmatprep.mubr.f32.mxu0 %v70_v16 }
  0x90   :  { %383 = vmatmul.mubr.f32.gmra.mrb[38].mxu0 %v69_v17 }
  0x91   :  { %388 = vmatprep.mubr.f32.mxu0 %v73_v18 }
  0x94   :  { %389 = vmatmul.mubr.f32.gmra.mrb[40].mxu0 %v72_v19 }
  0x95   :  { %394 = vmatprep.mubr.f32.mxu0 %v76_v21 }
  0x98   :  { %395 = vmatmul.mubr.f32.gmra.mrb[42].mxu0 %v75_v22 }
  0x99   :  { %400 = vmatprep.mubr.f32.mxu0 %v79_v24 }
  0x9c   :  { %401 = vmatmul.mubr.f32.gmra.mrb[44].mxu0 %v78_v25 }
  0x9d   :  { %406 = vmatprep.mubr.f32.mxu0 %v82_v26 }
  0xa0   :  { %407 = vmatmul.mubr.f32.gmra.mrb[46].mxu0 %v81_v27 }
  0xa1   :  { %412 = vmatprep.mubr.f32.mxu0 %v85_v29 }
  0xa4   :  { %413 = vmatmul.mubr.f32.gmra.mrb[48].mxu0 %v84_v30 }
  0xa5   :  { %418 = vmatprep.mubr.f32.mxu0 %v88_v31 }
  0xa8   :  { %419 = vmatmul.mubr.f32.gmra.mrb[50].mxu0 %v87_v32 }
  0xa9   :  { %424 = vmatprep.mubr.f32.mxu0 %v91_v33 }
  0xac   :  { %425 = vmatmul.mubr.f32.gmra.mrb[52].mxu0 %v90_v34 }
  0xad   :  { %430 = vmatprep.mubr.f32.mxu0 %v94_v35 }
  0xb0   :  { %431 = vmatmul.mubr.f32.gmra.mrb[54].mxu0 %v93_v48 }
  0xb1   :  { %436 = vmatprep.mubr.f32.mxu0 %v97_v36 }
  0xb4   :  { %437 = vmatmul.mubr.f32.gmra.mrb[56].mxu0 %v96_v52 }
  0xb5   :  { %442 = vmatprep.mubr.f32.mxu0 %v100_v39 }
  0xb8   :  { %443 = vmatmul.mubr.f32.gmra.mrb[58].mxu0 %v99_v60 }
  0xb9   :  { %448 = vmatprep.mubr.f32.mxu0 %v103_v40 }
  0xbc   :  { %449 = vmatmul.mubr.f32.gmra.mrb[60].mxu0 %v102_v0 }
  0xbd   :  { %454 = vmatprep.mubr.f32.mxu0 %v106_v9 }
  0xc0   :  { %455 = vmatmul.mubr.f32.gmra.mrb[62].mxu0 %v105_v41 }
  0xc1   :  { %525 = vmatprep.mubr.f32.mxu0 %v2979_v7 }
  0xc4   :  { %526 = vmatmul.mubr.f32.vlgmr.msra.gmra.mrb[0].mxu0 %v14_v14 }
  0xc5   :  { %531 = vmatprep.mubr.f32.mxu0 %v2979_v7 }
  0xc8   :  { %532 = vmatmul.mubr.f32.gmra.mrb[2].mxu0 %v17_v20 }
  0xc9   :  { %537 = vmatprep.mubr.f32.mxu0 %v2979_v7 }
  0xcc   :  { %538 = vmatmul.mubr.f32.gmra.mrb[4].mxu0 %v20_v42 }
  0xcd   :  { %543 = vmatprep.mubr.f32.mxu0 %v2979_v7 }
  0xd0   :  { %544 = vmatmul.mubr.f32.gmra.mrb[6].mxu0 %v23_v23 }
  0xd1   :  { %549 = vmatprep.mubr.f32.mxu0 %v2979_v7 }
  0xd4   :  { %550 = vmatmul.mubr.f32.gmra.mrb[8].mxu0 %v26_v28 }
  0xd5   :  { %555 = vmatprep.mubr.f32.mxu0 %v2979_v7 }
  0xd8   :  { %556 = vmatmul.mubr.f32.gmra.mrb[10].mxu0 %v29_v43 }
  0xd9   :  { %561 = vmatprep.mubr.f32.mxu0 %v2979_v7 }
  0xdc   :  { %562 = vmatmul.mubr.f32.gmra.mrb[12].mxu0 %v32_v37 }
  0xdd   :  { %567 = vmatprep.mubr.f32.mxu0 %v2979_v7 }
  0xe0   :  { %568 = vmatmul.mubr.f32.gmra.mrb[14].mxu0 %v35_v38 }
  0xe1   :  { %573 = vmatprep.mubr.f32.mxu0 %v2979_v7 }
  0xe4   :  { %574 = vmatmul.mubr.f32.gmra.mrb[16].mxu0 %v38_v44 }
  0xe5   :  { %579 = vmatprep.mubr.f32.mxu0 %v2979_v7 }
  0xe8   :  { %580 = vmatmul.mubr.f32.gmra.mrb[18].mxu0 %v41_v45 }
  0xe9   :  { %585 = vmatprep.mubr.f32.mxu0 %v2979_v7 }
  0xec   :  { %586 = vmatmul.mubr.f32.gmra.mrb[20].mxu0 %v44_v46 }
  0xed   :  { %591 = vmatprep.mubr.f32.mxu0 %v2979_v7 }
  0xf0   :  { %592 = vmatmul.mubr.f32.gmra.mrb[22].mxu0 %v47_v47 }
  0xf1   :  { %597 = vmatprep.mubr.f32.mxu0 %v2979_v7 }
  0xf4   :  { %598 = vmatmul.mubr.f32.gmra.mrb[24].mxu0 %v50_v49 }
  0xf5   :  { %603 = vmatprep.mubr.f32.mxu0 %v2979_v7 }
  0xf8   :  { %604 = vmatmul.mubr.f32.gmra.mrb[26].mxu0 %v53_v50 }
  0xf9   :  { %609 = vmatprep.mubr.f32.mxu0 %v2979_v7 }
  0xfc   :  { %610 = vmatmul.mubr.f32.gmra.mrb[28].mxu0 %v56_v51 }
  0xfd   :  { %615 = vmatprep.mubr.f32.mxu0 %v2979_v7 }
 0x100   :  { %616 = vmatmul.mubr.f32.gmra.mrb[30].mxu0 %v59_v53 }
 0x102   :  { %v623_v54 = vpop.f32.mrb[0].mxu1 }
 0x103   :  { %v625_v55 = vpop.f32.mrb[1].mxu1 }
 0x10f   :  { %v629_v56 = vpop.f32.mrb[2].mxu1 }
 0x110   :  { %v631_v57 = vpop.f32.mrb[3].mxu1 }
 0x113   :  { %v635_v58 = vpop.f32.mrb[4].mxu1 }
 0x114   :  { %v637_v59 = vpop.f32.mrb[5].mxu1 }
 0x117   :  { %v641_v61 = vpop.f32.mrb[6].mxu1 }
 0x118   :  { %v643_v62 = vpop.f32.mrb[7].mxu1 }
 0x11b   :  { %v647_v63 = vpop.f32.mrb[8].mxu1 }
 0x11c   :  { %v649_v1 = vpop.f32.mrb[9].mxu1 }
 0x11f   :  { %v653_v2 = vpop.f32.mrb[10].mxu1 }
 0x120   :  { %v655_v3 = vpop.f32.mrb[11].mxu1 }
 0x123   :  { %v659_v4 = vpop.f32.mrb[12].mxu1 }
 0x124   :  { %v661_v5 = vpop.f32.mrb[13].mxu1 }
 0x127   :  { %v665_v7 = vpop.f32.mrb[14].mxu1 }
 0x128   :  { %v667_v6 = vpop.f32.mrb[15].mxu1 }
 0x12b   :  { %v671_v8 = vpop.f32.mrb[16].mxu1 }
 0x12c   :  { %v673_v10 = vpop.f32.mrb[17].mxu1 }
 0x12f   :  { %v677_v11 = vpop.f32.mrb[18].mxu1 }
 0x130   :  { %v679_v12 = vpop.f32.mrb[19].mxu1 }
 0x133   :  { %v683_v13 = vpop.f32.mrb[20].mxu1 }
 0x134   :  { %v685_v15 = vpop.f32.mrb[21].mxu1 }
 0x137   :  { %v689_v16 = vpop.f32.mrb[22].mxu1 }
 0x138   :  { %v691_v17 = vpop.f32.mrb[23].mxu1 }
 0x13b   :  { %v3671_v18 = vpop.f32.mrb[24].mxu1 }
 0x13c   :  { %v3673_v19 = vpop.f32.mrb[25].mxu1 }
 0x13f   :  { %v3675_v21 = vpop.f32.mrb[26].mxu1 }
 0x140   :  { %v3677_v22 = vpop.f32.mrb[27].mxu1 }
 0x143   :  { %v3679_v24 = vpop.f32.mrb[28].mxu1 }
 0x144   :  { %v3681_v25 = vpop.f32.mrb[29].mxu1 }
 0x147   :  { %v3683_v26 = vpop.f32.mrb[30].mxu1 }
 0x148   :  { %v3685_v27 = vpop.f32.mrb[31].mxu1 }
 0x157   :  { %v366_v29 = vpop.f32.mrb[32].mxu0 }
 0x158   :  { %v3687_v30 = vadd.f32 %v623_v54, %v366_v29  ;;  %v368_v31 = vpop.f32.mrb[33].mxu0 }
 0x159   :  { %v626_v32 = vadd.f32 %v625_v55, %v368_v31 }
 0x15b   :  { %v372_v33 = vpop.f32.mrb[34].mxu0 }
 0x15c   :  { %v3689_v34 = vadd.f32 %v629_v56, %v372_v33  ;;  %v374_v35 = vpop.f32.mrb[35].mxu0 }
 0x15d   :  { %v632_v48 = vadd.f32 %v631_v57, %v374_v35 }
 0x15f   :  { %v3691_v36 = vpack.c.bf16 %v632_v48, %v626_v32  ;;  %v378_v52 = vpop.f32.mrb[36].mxu0 }
 0x160   :  { %v3693_v39 = vadd.f32 %v635_v58, %v378_v52  ;;  %v380_v60 = vpop.f32.mrb[37].mxu0 }
 0x161   :  { %v638_v40 = vadd.f32 %v637_v59, %v380_v60 }
 0x163   :  { %v384_v0 = vpop.f32.mrb[38].mxu0 }
 0x164   :  { %v3695_v9 = vadd.f32 %v641_v61, %v384_v0  ;;  %v386_v41 = vpop.f32.mrb[39].mxu0 }
 0x165   :  { %v644_v14 = vadd.f32 %v643_v62, %v386_v41 }
 0x167   :  { %v3697_v20 = vpack.c.bf16 %v644_v14, %v638_v40  ;;  %v390_v42 = vpop.f32.mrb[40].mxu0 }
 0x168   :  { %v3699_v23 = vadd.f32 %v647_v63, %v390_v42  ;;  %v392_v28 = vpop.f32.mrb[41].mxu0 }
 0x169   :  { %v650_v43 = vadd.f32 %v649_v1, %v392_v28 }
 0x16b   :  { %v396_v37 = vpop.f32.mrb[42].mxu0 }
 0x16c   :  { %v3701_v38 = vadd.f32 %v653_v2, %v396_v37  ;;  %v398_v44 = vpop.f32.mrb[43].mxu0 }
 0x16d   :  { %v656_v45 = vadd.f32 %v655_v3, %v398_v44 }
 0x16f   :  { %v3703_v46 = vpack.c.bf16 %v656_v45, %v650_v43  ;;  %v402_v47 = vpop.f32.mrb[44].mxu0 }
 0x170   :  { %v3705_v49 = vadd.f32 %v659_v4, %v402_v47  ;;  %v404_v50 = vpop.f32.mrb[45].mxu0 }
 0x171   :  { %v662_v51 = vadd.f32 %v661_v5, %v404_v50 }
 0x173   :  { %v408_v53 = vpop.f32.mrb[46].mxu0 }
 0x174   :  { %v3707_v54 = vadd.f32 %v665_v7, %v408_v53  ;;  %v410_v55 = vpop.f32.mrb[47].mxu0 }
 0x175   :  { %v668_v56 = vadd.f32 %v667_v6, %v410_v55 }
 0x177   :  { %v3709_v57 = vpack.c.bf16 %v668_v56, %v662_v51  ;;  %v414_v58 = vpop.f32.mrb[48].mxu0 }
 0x178   :  { %v3711_v59 = vadd.f32 %v671_v8, %v414_v58  ;;  %v416_v61 = vpop.f32.mrb[49].mxu0 }
 0x179   :  { %v674_v62 = vadd.f32 %v673_v10, %v416_v61 }
 0x17b   :  { %v420_v63 = vpop.f32.mrb[50].mxu0 }
 0x17c   :  { %v3713_v1 = vadd.f32 %v677_v11, %v420_v63  ;;  %v422_v2 = vpop.f32.mrb[51].mxu0 }
 0x17d   :  { %v680_v3 = vadd.f32 %v679_v12, %v422_v2 }
 0x17f   :  { %v3715_v4 = vpack.c.bf16 %v680_v3, %v674_v62  ;;  %v426_v5 = vpop.f32.mrb[52].mxu0 }
 0x180   :  { %v3717_v29 = vadd.f32 %v683_v13, %v426_v5  ;;  %v428_v7 = vpop.f32.mrb[53].mxu0 }
 0x181   :  { %v686_v31 = vadd.f32 %v685_v15, %v428_v7 }
 0x183   :  { %v432_v6 = vpop.f32.mrb[54].mxu0 }
 0x184   :  { %v3719_v32 = vadd.f32 %v689_v16, %v432_v6  ;;  %v434_v33 = vpop.f32.mrb[55].mxu0 }
 0x185   :  { %v692_v8 = vadd.f32 %v691_v17, %v434_v33 }
 0x187   :  { %v3721_v35 = vpack.c.bf16 %v692_v8, %v686_v31  ;;  %v438_v10 = vpop.f32.mrb[56].mxu0 }
 0x188   :  { %v3724_v11 = vadd.f32 %v3671_v18, %v438_v10  ;;  %v440_v48 = vpop.f32.mrb[57].mxu0 }
 0x189   :  { %v698_v12 = vadd.f32 %v3673_v19, %v440_v48 }
 0x18b   :  { %v444_v52 = vpop.f32.mrb[58].mxu0 }
 0x18c   :  { %v3728_v13 = vadd.f32 %v3675_v21, %v444_v52  ;;  %v446_v60 = vpop.f32.mrb[59].mxu0 }
 0x18d   :  { %v704_v15 = vadd.f32 %v3677_v22, %v446_v60 }
 0x18f   :  { %v3731_v16 = vpack.c.bf16 %v704_v15, %v698_v12  ;;  %v450_v40 = vpop.f32.mrb[60].mxu0 }
 0x190   :  { %v3734_v17 = vadd.f32 %v3679_v24, %v450_v40  ;;  %v452_v0 = vpop.f32.mrb[61].mxu0 }
 0x191   :  { %v710_v18 = vadd.f32 %v3681_v25, %v452_v0 }
 0x193   :  { %v456_v41 = vpop.f32.mrb[62].mxu0 }
 0x194   :  { %v3738_v14 = vadd.f32 %v3683_v26, %v456_v41  ;;  %v458_v19 = vpop.f32.mrb[63].mxu0 }
 0x195   :  { %v716_v21 = vadd.f32 %v3685_v27, %v458_v19 }
 0x197   :  { %v3741_v42 = vpack.c.bf16 %v716_v21, %v710_v18  ;;  %v527_v22 = vpop.f32.mrb[0].mxu0 }
 0x198   :  { %v529_v28 = vpop.f32.mrb[1].mxu0  ;;  %2214 = vmatprep.mubr.msk.f32.mxu1 %vm801_vm0, %v527_v22 }
 0x19b   :  { %v3744_v43 = vpop.f32.mrb[2].mxu0 }
 0x19c   :  { %v535_v24 = vpop.f32.mrb[3].mxu0  ;;  %v2747_v37 = vpack.i.bf16 %v3744_v43, %v527_v22 }
 0x19d   :  { %v3747_v25 = vpack.c.bf16 %v535_v24, %v529_v28 }
 0x19e   :  { %2748 = vrot.lane.b32.xlu0 %v2747_v37, %s2980_s0 }
 0x19f   :  { %v3750_v26 = vpop.f32.mrb[4].mxu0 }
 0x1a0   :  { %v541_v27 = vpop.f32.mrb[5].mxu0 }
 0x1a3   :  { %v3752_v44 = vpop.f32.mrb[6].mxu0 }
 0x1a4   :  { %v2752_v45 = vpack.i.bf16 %v3752_v44, %v3750_v26  ;;  %v547_v47 = vpop.f32.mrb[7].mxu0 }
 0x1a5   :  { %v3756_v50 = vpack.c.bf16 %v547_v47, %v541_v27 }
 0x1a6   :  { %2753 = vrot.lane.b32.xlu0 %v2752_v45, %s2980_s0 }
 0x1a7   :  { %v3759_v51 = vpop.f32.mrb[8].mxu0 }
 0x1a8   :  { %v553_v53 = vpop.f32.mrb[9].mxu0 }
 0x1ab   :  { %v3761_v55 = vpop.f32.mrb[10].mxu0 }
 0x1ac   :  { %v559_v56 = vpop.f32.mrb[11].mxu0  ;;  %v2757_v58 = vpack.i.bf16 %v3761_v55, %v3759_v51 }
 0x1ad   :  { %v3765_v61 = vpack.c.bf16 %v559_v56, %v553_v53  ;;  %v2787_v56 = vpack.i.bf16 %v3689_v34, %v3687_v30 }
 0x1ae   :  { %2758 = vrot.lane.b32.xlu1 %v2757_v58, %s2980_s0 }
 0x1af   :  { %v3768_v62 = vpop.f32.mrb[12].mxu0 }
 0x1b0   :  { %v565_v63 = vpop.f32.mrb[13].mxu0 }
 0x1b3   :  { %v3770_v2 = vpop.f32.mrb[14].mxu0 }
 0x1b4   :  { %v2762_v3 = vpack.i.bf16 %v3770_v2, %v3768_v62  ;;  %v571_v5 = vpop.f32.mrb[15].mxu0 }
 0x1b5   :  { %v3774_v7 = vpack.c.bf16 %v571_v5, %v565_v63 }
 0x1b6   :  { %2763 = vrot.lane.b32.xlu1 %v2762_v3, %s2980_s0 }
 0x1b7   :  { %v3777_v31 = vpop.f32.mrb[16].mxu0 }
 0x1b8   :  { %v577_v6 = vpop.f32.mrb[17].mxu0 }
 0x1bb   :  { %v3779_v33 = vpop.f32.mrb[18].mxu0 }
 0x1bc   :  { %v2767_v8 = vpack.i.bf16 %v3779_v33, %v3777_v31  ;;  %v583_v10 = vpop.f32.mrb[19].mxu0 }
 0x1bd   :  { %v3783_v48 = vpack.c.bf16 %v583_v10, %v577_v6 }
 0x1be   :  { %2768 = vrot.lane.b32.xlu0 %v2767_v8, %s2980_s0 }
 0x1bf   :  { %v3786_v12 = vpop.f32.mrb[20].mxu0 }
 0x1c0   :  { %v589_v52 = vpop.f32.mrb[21].mxu0 }
 0x1c3   :  { %v3788_v60 = vpop.f32.mrb[22].mxu0 }
 0x1c4   :  { %v2772_v15 = vpack.i.bf16 %v3788_v60, %v3786_v12  ;;  %v595_v40 = vpop.f32.mrb[23].mxu0 }
 0x1c5   :  { %v3792_v0 = vpack.c.bf16 %v595_v40, %v589_v52 }
 0x1c6   :  { %2773 = vrot.lane.b32.xlu1 %v2772_v15, %s2980_s0 }
 0x1c7   :  { %v3795_v18 = vpop.f32.mrb[24].mxu0 }
 0x1c8   :  { %v601_v41 = vpop.f32.mrb[25].mxu0 }
 0x1cb   :  { %v3797_v19 = vpop.f32.mrb[26].mxu0 }
 0x1cc   :  { %v2777_v21 = vpack.i.bf16 %v3797_v19, %v3795_v18  ;;  %v607_v22 = vpop.f32.mrb[27].mxu0 }
 0x1cd   :  { %v3801_v28 = vpack.c.bf16 %v607_v22, %v601_v41 }
 0x1ce   :  { %2778 = vrot.lane.b32.xlu0 %v2777_v21, %s2980_s0 }
 0x1cf   :  { %v3804_v24 = vpop.f32.mrb[28].mxu0 }
 0x1d0   :  { %v613_v37 = vpop.f32.mrb[29].mxu0 }
 0x1d3   :  { %v3806_v27 = vpop.f32.mrb[30].mxu0 }
 0x1d4   :  { %v2782_v45 = vpack.i.bf16 %v3806_v27, %v3804_v24  ;;  %v619_v47 = vpop.f32.mrb[31].mxu0 }
 0x1d5   :  { %v3810_v53 = vpack.c.bf16 %v619_v47, %v613_v37 }
 0x1d6   :  { %2783 = vrot.lane.b32.xlu1 %v2782_v45, %s2980_s0 }
 0x1da   :  { %2788 = vrot.lane.b32.xlu1 %v2787_v56, %s2980_s0 }
 0x210   :  { %v2749_v58 = vpop.permute.xlu0 %2748 }
 0x211   :  { %v2751_v63 = vunpack.i.h.bf16 %v2749_v58  ;;  %v2750_v3 = vunpack.i.l.bf16 %v2749_v58 }
 0x213   :  { %v2502_v6 = vpack.c.bf16 %v2751_v63, %v2750_v3 }
 0x215   :  { %2504 = vmatprep.subr.msk.bf16.mxu1 %vm3818_vm1, %v2502_v6 }
 0x216   :  { %2507 = vmatpush3.bf16.xpose.msk.msra.mxu1 %vm3818_vm1, %v2502_v6 }
 0x218   :  { %v2754_v8 = vpop.permute.xlu0 %2753 }
 0x219   :  { %v2756_v10 = vunpack.i.h.bf16 %v2754_v8  ;;  %v2755_v52 = vunpack.i.l.bf16 %v2754_v8 }
 0x21b   :  { %v2508_v15 = vpack.c.bf16 %v2756_v10, %v2755_v52 }
 0x21d   :  { %2510 = vmatprep.subr.msk.bf16.mxu1 %vm3818_vm1, %v2508_v15 }
 0x21e   :  { %2513 = vmatpush3.bf16.xpose.msk.msra.mxu1 %vm3818_vm1, %v2508_v15 }
 0x220   :  { %v2759_v40 = vpop.permute.xlu1 %2758 }
 0x221   :  { %v2761_v41 = vunpack.i.h.bf16 %v2759_v40  ;;  %v2760_v21 = vunpack.i.l.bf16 %v2759_v40 }
 0x223   :  { %v2514_v22 = vpack.c.bf16 %v2761_v41, %v2760_v21 }
 0x225   :  { %2516 = vmatprep.subr.msk.bf16.mxu1 %vm3818_vm1, %v2514_v22 }
 0x226   :  { %2519 = vmatpush3.bf16.xpose.msk.msra.mxu1 %vm3818_vm1, %v2514_v22 }
 0x228   :  { %v2764_v37 = vpop.permute.xlu1 %2763 }
 0x229   :  { %v2766_v45 = vunpack.i.h.bf16 %v2764_v37  ;;  %v2765_v47 = vunpack.i.l.bf16 %v2764_v37 }
 0x22b   :  { %v2520_v56 = vpack.c.bf16 %v2766_v45, %v2765_v47 }
 0x22d   :  { %2522 = vmatprep.subr.msk.bf16.mxu1 %vm3818_vm1, %v2520_v56 }
 0x22e   :  { %2525 = vmatpush3.bf16.xpose.msk.msra.mxu1 %vm3818_vm1, %v2520_v56 }
 0x230   :  { %v2769_v58 = vpop.permute.xlu0 %2768 }
 0x231   :  { %v2771_v63 = vunpack.i.h.bf16 %v2769_v58  ;;  %v2770_v3 = vunpack.i.l.bf16 %v2769_v58 }
 0x233   :  { %v2526_v6 = vpack.c.bf16 %v2771_v63, %v2770_v3 }
 0x235   :  { %2528 = vmatprep.subr.msk.bf16.mxu1 %vm3818_vm1, %v2526_v6 }
 0x236   :  { %2531 = vmatpush3.bf16.xpose.msk.msra.mxu1 %vm3818_vm1, %v2526_v6 }
 0x238   :  { %v2774_v8 = vpop.permute.xlu1 %2773 }
 0x239   :  { %v2776_v10 = vunpack.i.h.bf16 %v2774_v8  ;;  %v2775_v52 = vunpack.i.l.bf16 %v2774_v8  ;;  %v2797_v8 = vpack.i.bf16 %v3701_v38, %v3699_v23 }
 0x23b   :  { %v2532_v15 = vpack.c.bf16 %v2776_v10, %v2775_v52 }
 0x23d   :  { %2534 = vmatprep.subr.msk.bf16.mxu1 %vm3818_vm1, %v2532_v15 }
 0x23e   :  { %2537 = vmatpush3.bf16.xpose.msk.msra.mxu1 %vm3818_vm1, %v2532_v15 }
 0x240   :  { %v2779_v40 = vpop.permute.xlu0 %2778 }
 0x241   :  { %v2781_v41 = vunpack.i.h.bf16 %v2779_v40  ;;  %v2780_v21 = vunpack.i.l.bf16 %v2779_v40  ;;  %v2792_v40 = vpack.i.bf16 %v3695_v9, %v3693_v39 }
 0x243   :  { %v2538_v22 = vpack.c.bf16 %v2781_v41, %v2780_v21 }
 0x245   :  { %2540 = vmatprep.subr.msk.bf16.mxu1 %vm3818_vm1, %v2538_v22 }
 0x246   :  { %2543 = vmatpush3.bf16.xpose.msk.msra.mxu1 %vm3818_vm1, %v2538_v22 }
 0x248   :  { %v2784_v37 = vpop.permute.xlu1 %2783 }
 0x249   :  { %v2786_v45 = vunpack.i.h.bf16 %v2784_v37  ;;  %v2785_v47 = vunpack.i.l.bf16 %v2784_v37 }
 0x24b   :  { %v2544_v56 = vpack.c.bf16 %v2786_v45, %v2785_v47 }
 0x24d   :  { %2546 = vmatprep.subr.msk.bf16.mxu1 %vm3818_vm1, %v2544_v56 }
 0x24e   :  { %2549 = vmatpush3.bf16.xpose.msk.msra.mxu1 %vm3818_vm1, %v2544_v56 }
 0x24f   :  { %2551 = vmatprep.subr.bf16.mxu1 %v3747_v25 }
 0x255   :  { %2215 = vmatmul.mubr.msk.f32.vlgmr.msra.gmra.mrb[32].mxu1 %vm801_vm0, %v3744_v43  ;;  %v2789_v43 = vpop.permute.xlu1 %2788 }
 0x256   :  { %2217 = vmatprep.mubr.msk.f32.mxu1 %vm801_vm0, %v3750_v26  ;;  %2553 = vmatpush3.bf16.msra.mxu1 %v3747_v25  ;;  %v2791_v25 = vunpack.i.h.bf16 %v2789_v43  ;;  %v2790_v26 = vunpack.i.l.bf16 %v2789_v43 }
 0x257   :  { %2555 = vmatprep.subr.bf16.mxu1 %v3756_v50 }
 0x259   :  { %2218 = vmatmul.mubr.msk.f32.gmra.mrb[34].mxu1 %vm801_vm0, %v3752_v44  ;;  %v3897_v44 = vpack.c.bf16 %v2791_v25, %v2790_v26 }
 0x25a   :  { %2220 = vmatprep.mubr.msk.f32.mxu1 %vm801_vm0, %v3759_v51  ;;  %2557 = vmatpush3.bf16.msra.mxu1 %v3756_v50  ;;  %v718_v50 = vlaneseq }
 0x25b   :  { %2559 = vmatprep.subr.bf16.mxu1 %v3765_v61 }
 0x25c   :  { %v3905_v51 = vshrl.u32 %v718_v50, 7 }
 0x25d   :  { %2221 = vmatmul.mubr.msk.f32.gmra.mrb[36].mxu1 %vm801_vm0, %v3761_v55  ;;  %v3907_v55 = vand.u32 127, %v718_v50 }
 0x25e   :  { %2223 = vmatprep.mubr.msk.f32.mxu1 %vm801_vm0, %v3768_v62  ;;  %2561 = vmatpush3.bf16.msra.mxu1 %v3765_v61  ;;  %v3910_v61 = vadd.s32 56, %v3905_v51  ;;  %v3915_v62 = vadd.s32 72, %v3905_v51  ;;  %v3975_v45 = vadd.s32 32, %v3905_v51  ;;  %v3978_v47 = vadd.s32 24, %v3905_v51 }
 0x25f   :  { %2563 = vmatprep.subr.bf16.mxu1 %v3774_v7  ;;  %vm737_vm11 = vcmp.le.s32.totalorder %v3907_v55, %v3905_v51  ;;  %v3983_v56 = vadd.s32 48, %v3905_v51  ;;  %v3988_v43 = vadd.s32 16, %v3905_v51  ;;  %v3999_v50 = vadd.s32 64, %v3905_v51 }
 0x260   :  { %4495 = vst [vmem:[#allocation5_spill] sm:$0xff] %v3910_v61  ;;  %vm744_vm2 = vcmp.le.s32.totalorder %v3907_v55, %v3910_v61  ;;  %4496 = vst [vmem:[#allocation6_spill] sm:$0xff] %v3915_v62  ;;  %vm746_vm3 = vcmp.le.s32.totalorder %v3907_v55, %v3915_v62  ;;  %vm4477_vm12 = vcmp.le.s32.totalorder %v3907_v55, %v3975_v45 }
 0x261   :  { %2224 = vmatmul.mubr.msk.f32.gmra.mrb[38].mxu1 %vm801_vm0, %v3770_v2  ;;  %v3920_v2 = vadd.s32 88, %v3905_v51  ;;  %4503 = vst [vmem:[#allocation13_spill] sm:$0xff] %v3975_v45  ;;  %4504 = vst [vmem:[#allocation14_spill] sm:$0xff] %v3978_v47  ;;  %vm4478_vm13 = vcmp.le.s32.totalorder %v3907_v55, %v3978_v47  ;;  %vm743_vm14 = vcmp.le.s32.totalorder %v3907_v55, %v3983_v56 }
 0x262   :  { %2226 = vmatprep.mubr.msk.f32.mxu1 %vm801_vm0, %v3777_v31  ;;  %2565 = vmatpush3.bf16.msra.mxu1 %v3774_v7  ;;  %v3923_v7 = vadd.s32 80, %v3905_v51  ;;  %v3930_v31 = vadd.s32 104, %v3905_v51  ;;  %4505 = vst [vmem:[#allocation15_spill] sm:$0xff] %v3983_v56  ;;  %4506 = vst [vmem:[#allocation16_spill] sm:$0xff] %v3988_v43  ;;  %vm739_vm15 = vcmp.le.s32.totalorder %v3907_v55, %v3988_v43 }
 0x263   :  { %2567 = vmatprep.subr.bf16.mxu1 %v3783_v48  ;;  %4497 = vst [vmem:[#allocation7_spill] sm:$0xff] %v3920_v2  ;;  %vm748_vm4 = vcmp.le.s32.totalorder %v3907_v55, %v3920_v2  ;;  %4507 = vst [vmem:[#allocation17_spill] sm:$0xff] %v3999_v50 }
 0x264   :  { %4498 = vst [vmem:[#allocation8_spill] sm:$0xff] %v3923_v7  ;;  %vm747_vm5 = vcmp.le.s32.totalorder %v3907_v55, %v3923_v7  ;;  %4499 = vst [vmem:[#allocation9_spill] sm:$0xff] %v3930_v31  ;;  %vm750_vm6 = vcmp.le.s32.totalorder %v3907_v55, %v3930_v31 }
 0x265   :  { %2227 = vmatmul.mubr.msk.f32.gmra.mrb[40].mxu1 %vm801_vm0, %v3779_v33  ;;  %v3933_v33 = vadd.s32 96, %v3905_v51 }
 0x266   :  { %2229 = vmatprep.mubr.msk.f32.mxu1 %vm801_vm0, %v3786_v12  ;;  %2569 = vmatpush3.bf16.msra.mxu1 %v3783_v48  ;;  %v3940_v48 = vadd.s32 120, %v3905_v51  ;;  %v3943_v12 = vadd.s32 112, %v3905_v51 }
 0x267   :  { %2571 = vmatprep.subr.bf16.mxu1 %v3792_v0  ;;  %4500 = vst [vmem:[#allocation10_spill] sm:$0xff] %v3933_v33  ;;  %vm749_vm7 = vcmp.le.s32.totalorder %v3907_v55, %v3933_v33 }
 0x268   :  { %4501 = vst [vmem:[#allocation11_spill] sm:$0xff] %v3940_v48  ;;  %4502 = vst [vmem:[#allocation12_spill] sm:$0xff] %v3943_v12  ;;  %vm752_vm8 = vcmp.le.s32.totalorder %v3907_v55, %v3940_v48  ;;  %vm751_vm9 = vcmp.le.s32.totalorder %v3907_v55, %v3943_v12 }
 0x269   :  { %2230 = vmatmul.mubr.msk.f32.gmra.mrb[42].mxu1 %vm801_vm0, %v3788_v60  ;;  %v3950_v60 = vadd.s32 8, %v3905_v51 }
 0x26a   :  { %2232 = vmatprep.mubr.msk.f32.mxu1 %vm801_vm0, %v3795_v18  ;;  %2573 = vmatpush3.bf16.msra.mxu1 %v3792_v0 }
 0x26b   :  { %2575 = vmatprep.subr.bf16.mxu1 %v3801_v28  ;;  %vm738_vm10 = vcmp.le.s32.totalorder %v3907_v55, %v3950_v60 }
 0x26d   :  { %2233 = vmatmul.mubr.msk.f32.gmra.mrb[44].mxu1 %vm801_vm0, %v3797_v19 }
 0x26e   :  { %2235 = vmatprep.mubr.msk.f32.mxu1 %vm801_vm0, %v3804_v24  ;;  %2577 = vmatpush3.bf16.msra.mxu1 %v3801_v28 }
 0x26f   :  { %2579 = vmatprep.subr.bf16.mxu1 %v3810_v53 }
 0x271   :  { %2236 = vmatmul.mubr.msk.f32.gmra.mrb[46].mxu1 %vm801_vm0, %v3806_v27 }
 0x272   :  { %2581 = vmatpush3.bf16.msra.mxu1 %v3810_v53 }
 0x273   :  { %2584 = vmatprep.subr.msk.bf16.mxu1 %vm3818_vm1, %v3897_v44 }
 0x328   :  { %v2216_v0 = vpop.f32.mrb[32].mxu1 }
 0x329   :  { %v932_v18 = vpop.f32.mrb[33].mxu1  ;;  %v3959_v19 = vsel %vm738_vm10, %v2216_v0, -inf  ;;  %v4004_v0 = vadd.s32 40, %v3905_v51 }
 0x32a   :  { %1029 = vmax.xlane.f32.xlu1 %v3959_v19  ;;  %v3965_v28 = vsel %vm737_vm11, %v932_v18, -inf }
 0x32b   :  { %1027 = vmax.xlane.f32.xlu0 %v3965_v28  ;;  %4508 = vst [vmem:[#allocation18_spill] sm:$0xff] %v4004_v0 }
 0x32c   :  { %v2219_v24 = vpop.f32.mrb[34].mxu1 }
 0x32d   :  { %v942_v27 = vpop.f32.mrb[35].mxu1  ;;  %v1014_v26 = vsel %vm4478_vm13, %v2219_v24, -inf  ;;  %vm742_vm13 = vcmp.le.s32.totalorder %v3907_v55, %v4004_v0 }
 0x32e   :  { %v1013_v24 = vsel %vm739_vm15, %v942_v27, -inf }
 0x330   :  { %v2222_v53 = vpop.f32.mrb[36].mxu1 }
 0x331   :  { %v952_v58 = vpop.f32.mrb[37].mxu1 }
 0x332   :  { %v1015_v25 = vsel %vm4477_vm12, %v952_v58, -inf  ;;  %vm745_vm12 = vcmp.le.s32.totalorder %v3907_v55, %v3999_v50 }
 0x334   :  { %v2225_v63 = vpop.f32.mrb[38].mxu1 }
 0x335   :  { %v962_v3 = vpop.f32.mrb[39].mxu1 }
 0x336   :  { %v4009_v18 = vsel %vm743_vm14, %v962_v3, -inf  ;;  %v1016_v3 = vsel %vm742_vm13, %v2222_v53, -inf }
 0x338   :  { %v2228_v6 = vpop.f32.mrb[40].mxu1 }
 0x339   :  { %v972_v10 = vpop.f32.mrb[41].mxu1  ;;  %v1020_v53 = vsel %vm746_vm3, %v2228_v6, -inf }
 0x33a   :  { %v4022_v58 = vsel %vm745_vm12, %v972_v10, -inf }
 0x33b   :  { %2798 = vrot.lane.b32.xlu1 %v2797_v8, %s2980_s0  ;;  %v1018_v8 = vsel %vm744_vm2, %v2225_v63, -inf }
 0x33c   :  { %v2231_v52 = vpop.f32.mrb[42].mxu1 }
 0x33d   :  { %v982_v15 = vpop.f32.mrb[43].mxu1  ;;  %v1022_v63 = vsel %vm748_vm4, %v2231_v52, -inf }
 0x33e   :  { %v4031_v27 = vsel %vm747_vm5, %v982_v15, -inf }
 0x340   :  { %v2234_v41 = vpop.f32.mrb[44].mxu1 }
 0x341   :  { %2793 = vrot.lane.b32.xlu0 %v2792_v40, %s2980_s0  ;;  %v992_v21 = vpop.f32.mrb[45].mxu1  ;;  %v4058_v40 = vsel %vm750_vm6, %v2234_v41, -inf }
 0x342   :  { %v4040_v10 = vsel %vm749_vm7, %v992_v21, -inf }
 0x344   :  { %v2237_v22 = vpop.f32.mrb[46].mxu1 }
 0x345   :  { %v1002_v37 = vpop.f32.mrb[47].mxu1  ;;  %v4064_v6 = vsel %vm752_vm8, %v2237_v22, -inf  ;;  %v2802_v22 = vpack.i.bf16 %v3707_v54, %v3705_v49 }
 0x346   :  { %v4049_v15 = vsel %vm751_vm9, %v1002_v37, -inf }
 0x35f   :  { %1035 = vmax.xlane.f32.xlu1 %v1015_v25 }
 0x360   :  { %1033 = vmax.xlane.f32.xlu0 %v1014_v26 }
 0x363   :  { %1039 = vmax.xlane.f32.xlu1 %v4009_v18 }
 0x364   :  { %1031 = vmax.xlane.f32.xlu0 %v1013_v24 }
 0x367   :  { %1043 = vmax.xlane.f32.xlu1 %v4022_v58 }
 0x368   :  { %1037 = vmax.xlane.f32.xlu0 %v1016_v3 }
 0x36b   :  { %1047 = vmax.xlane.f32.xlu1 %v4031_v27 }
 0x36c   :  { %1041 = vmax.xlane.f32.xlu0 %v1018_v8 }
 0x36f   :  { %1051 = vmax.xlane.f32.xlu1 %v4040_v10 }
 0x370   :  { %1045 = vmax.xlane.f32.xlu0 %v1020_v53 }
 0x373   :  { %1055 = vmax.xlane.f32.xlu1 %v4049_v15 }
 0x374   :  { %1049 = vmax.xlane.f32.xlu0 %v1022_v63 }
 0x378   :  { %1053 = vmax.xlane.f32.xlu0 %v4058_v40 }
 0x37c   :  { %1057 = vmax.xlane.f32.xlu0 %v4064_v6 }
 0x3b7   :  { %v1030_v21 = vpop.xlane.xlu1 %1029 }
 0x3b8   :  { %v1060_v37 = vsub.f32 %v3959_v19, %v1030_v21  ;;  %v1028_v12 = vpop.xlane.xlu0 %1027 }
 0x3b9   :  { %v1059_v52 = vsub.f32 %v3965_v28, %v1028_v12  ;;  %v2807_v12 = vpack.i.bf16 %v3713_v1, %v3711_v59 }
 0x3ba   :  { %v1077_v33 = vmul.f32 1.442695, %v1060_v37 }
 0x3bb   :  { %v1075_v7 = vmul.f32 1.442695, %v1059_v52 }
 0x3bc   :  { %2827 = vpow2.f32 %v1077_v33  ;;  %v4081_v33 = vpop.permute.xlu0 %2793 }
 0x3bd   :  { %2829 = vpow2.f32 %v1075_v7  ;;  %v4083_v7 = vpop.permute.xlu1 %2798 }
 0x3c6   :  { %v4069_v41 = vpop.eup %2827 }
 0x3c7   :  { %v4071_v50 = vpop.eup %2829  ;;  %1109 = vadd.xlane.f32.xlu0 %v4069_v41 }
 0x3c8   :  { %1107 = vadd.xlane.f32.xlu1 %v4071_v50 }
 0x3d9   :  { %2803 = vrot.lane.b32.xlu1 %v2802_v22, %s2980_s0 }
 0x3dd   :  { %2808 = vrot.lane.b32.xlu0 %v2807_v12, %s2980_s0 }
 0x3ec   :  { %v1036_v28 = vpop.xlane.xlu1 %1035 }
 0x3ed   :  { %v1034_v19 = vpop.xlane.xlu0 %1033  ;;  %v1063_v52 = vsub.f32 %v1015_v25, %v1036_v28 }
 0x3ee   :  { %v1062_v21 = vsub.f32 %v1014_v26, %v1034_v19 }
 0x3ef   :  { %v1083_v31 = vmul.f32 1.442695, %v1063_v52 }
 0x3f0   :  { %v1081_v37 = vmul.f32 1.442695, %v1062_v21  ;;  %v1040_v61 = vpop.xlane.xlu1 %1039 }
 0x3f1   :  { %v1032_v62 = vpop.xlane.xlu0 %1031  ;;  %v1065_v0 = vsub.f32 %v4009_v18, %v1040_v61 }
 0x3f2   :  { %2831 = vpow2.f32 %v1081_v37  ;;  %v1061_v48 = vsub.f32 %v1013_v24, %v1032_v62 }
 0x3f3   :  { %v1087_v62 = vmul.f32 1.442695, %v1065_v0 }
 0x3f4   :  { %v1079_v56 = vmul.f32 1.442695, %v1061_v48  ;;  %v1044_v26 = vpop.xlane.xlu1 %1043 }
 0x3f5   :  { %v1038_v22 = vpop.xlane.xlu0 %1037  ;;  %v1067_v61 = vsub.f32 %v4022_v58, %v1044_v26 }
 0x3f6   :  { %2833 = vpow2.f32 %v1079_v56  ;;  %v1064_v2 = vsub.f32 %v1016_v3, %v1038_v22 }
 0x3f7   :  { %2835 = vpow2.f32 %v1083_v31 }
 0x3f8   :  { %v1085_v45 = vmul.f32 1.442695, %v1064_v2  ;;  %v1048_v31 = vpop.xlane.xlu1 %1047 }
 0x3f9   :  { %v1042_v12 = vpop.xlane.xlu0 %1041  ;;  %v1069_v0 = vsub.f32 %v4031_v27, %v1048_v31 }
 0x3fa   :  { %2837 = vpow2.f32 %v1085_v45  ;;  %v1066_v43 = vsub.f32 %v1018_v8, %v1042_v12 }
 0x3fb   :  { %v1095_v58 = vmul.f32 1.442695, %v1069_v0  ;;  %v2822_v0 = vpack.i.bf16 %v3738_v14, %v3734_v17 }
 0x3fc   :  { %v4086_v47 = vpop.eup %2831  ;;  %v1089_v25 = vmul.f32 1.442695, %v1066_v43  ;;  %v1052_v21 = vpop.xlane.xlu1 %1051 }
 0x3fd   :  { %v1046_v19 = vpop.xlane.xlu0 %1045  ;;  %1113 = vadd.xlane.f32.xlu0 %v4086_v47  ;;  %v1071_v12 = vsub.f32 %v4040_v10, %v1052_v21 }
 0x3fe   :  { %2839 = vpow2.f32 %v1089_v25  ;;  %v1068_v48 = vsub.f32 %v1020_v53, %v1046_v19  ;;  %v1091_v53 = vmul.f32 1.442695, %v1067_v61 }
 0x3ff   :  { %2841 = vpow2.f32 %v1087_v62 }
 0x400   :  { %v4089_v24 = vpop.eup %2833  ;;  %v1093_v56 = vmul.f32 1.442695, %v1068_v48  ;;  %v1056_v19 = vpop.xlane.xlu1 %1055 }
 0x401   :  { %v1050_v2 = vpop.xlane.xlu0 %1049  ;;  %1111 = vadd.xlane.f32.xlu1 %v4089_v24  ;;  %v4093_v18 = vpop.eup %2835 }
 0x402   :  { %v1070_v45 = vsub.f32 %v1022_v63, %v1050_v2  ;;  %2843 = vpow2.f32 %v1093_v56 }
 0x404   :  { %v4095_v43 = vpop.eup %2837  ;;  %v1097_v3 = vmul.f32 1.442695, %v1070_v45  ;;  %v2812_v45 = vpack.i.bf16 %v3719_v32, %v3717_v29 }
 0x405   :  { %v1054_v8 = vpop.xlane.xlu0 %1053  ;;  %1117 = vadd.xlane.f32.xlu0 %v4095_v43  ;;  %1115 = vadd.xlane.f32.xlu1 %v4093_v18 }
 0x406   :  { %2845 = vpow2.f32 %v1097_v3  ;;  %v1072_v37 = vsub.f32 %v4058_v40, %v1054_v8  ;;  %v1099_v40 = vmul.f32 1.442695, %v1071_v12  ;;  %v2817_v3 = vpack.i.bf16 %v3728_v13, %v3724_v11 }
 0x407   :  { %2847 = vpow2.f32 %v1091_v53 }
 0x408   :  { %v4100_v28 = vpop.eup %2839  ;;  %2849 = vpow2.f32 %v1095_v58  ;;  %v1101_v26 = vmul.f32 1.442695, %v1072_v37  ;;  %v2795_v37 = vunpack.i.l.bf16 %v4081_v33 }
 0x409   :  { %1121 = vadd.xlane.f32.xlu0 %v4100_v28  ;;  %v1058_v63 = vpop.xlane.xlu0 %1057  ;;  %v4105_v52 = vpop.eup %2841 }
 0x40a   :  { %v1074_v27 = vsub.f32 %v4064_v6, %v1058_v63  ;;  %v1073_v6 = vsub.f32 %v4049_v15, %v1056_v19  ;;  %v2796_v63 = vunpack.i.h.bf16 %v4081_v33  ;;  %v2800_v19 = vunpack.i.l.bf16 %v4083_v7 }
 0x40c   :  { %v1105_v22 = vmul.f32 1.442695, %v1074_v27  ;;  %v4109_v25 = vpop.eup %2843  ;;  %v1103_v10 = vmul.f32 1.442695, %v1073_v6  ;;  %v2588_v12 = vpack.c.bf16 %v2796_v63, %v2795_v37 }
 0x40d   :  { %1119 = vadd.xlane.f32.xlu0 %v4105_v52 }
 0x40e   :  { %2851 = vpow2.f32 %v1105_v22 }
 0x40f   :  { %2853 = vpow2.f32 %v1101_v26  ;;  %v2801_v26 = vunpack.i.h.bf16 %v4083_v7 }
 0x410   :  { %v4111_v62 = vpop.eup %2845  ;;  %2855 = vpow2.f32 %v1099_v40 }
 0x411   :  { %1125 = vadd.xlane.f32.xlu0 %v4109_v25  ;;  %1129 = vadd.xlane.f32.xlu1 %v4111_v62  ;;  %v4116_v48 = vpop.eup %2847  ;;  %2857 = vpow2.f32 %v1103_v10  ;;  %v2594_v40 = vpack.c.bf16 %v2801_v26, %v2800_v19 }
 0x412   :  { %v4119_v56 = vpop.eup %2849 }
 0x415   :  { %1123 = vadd.xlane.f32.xlu0 %v4116_v48 }
 0x418   :  { %v4121_v2 = vpop.eup %2851 }
 0x419   :  { %1127 = vadd.xlane.f32.xlu0 %v4119_v56  ;;  %1137 = vadd.xlane.f32.xlu1 %v4121_v2  ;;  %v4125_v61 = vpop.eup %2853 }
 0x41a   :  { %v4128_v15 = vpop.eup %2855 }
 0x41b   :  { %v4131_v31 = vpop.eup %2857 }
 0x41d   :  { %1133 = vadd.xlane.f32.xlu0 %v4125_v61 }
 0x421   :  { %1131 = vadd.xlane.f32.xlu0 %v4128_v15 }
 0x425   :  { %1135 = vadd.xlane.f32.xlu0 %v4131_v31 }
 0x42a   :  { %2813 = vrot.lane.b32.xlu1 %v2812_v45, %s2980_s0 }
 0x42e   :  { %2818 = vrot.lane.b32.xlu1 %v2817_v3, %s2980_s0 }
 0x432   :  { %2823 = vrot.lane.b32.xlu1 %v2822_v0, %s2980_s0 }
 0x454   :  { %v1110_v8 = vpop.xlane.xlu0 %1109 }
 0x455   :  { %2859 = vrcp.f32 %v1110_v8  ;;  %v1108_v53 = vpop.xlane.xlu1 %1107 }
 0x456   :  { %2861 = vrcp.f32 %v1108_v53 }
 0x458   :  { %v2809_v10 = vpop.permute.xlu0 %2808 }
 0x459   :  { %v2804_v33 = vpop.permute.xlu1 %2803  ;;  %v2810_v7 = vunpack.i.l.bf16 %v2809_v10 }
 0x45f   :  { %v2860_v58 = vpop.eup %2859 }
 0x460   :  { %v2862_v21 = vpop.eup %2861  ;;  %v1156_v22 = vmul.f32 %v2860_v58, %v4069_v41  ;;  %v2805_v41 = vunpack.i.l.bf16 %v2804_v33 }
 0x461   :  { %v1155_v27 = vmul.f32 %v2862_v21, %v4071_v50  ;;  %v2806_v50 = vunpack.i.h.bf16 %v2804_v33 }
 0x463   :  { %2270 = vmatprep.mubr.f32.mxu1 %v1155_v27  ;;  %v2600_v6 = vpack.c.bf16 %v2806_v50, %v2805_v41 }
 0x464   :  { %2271 = vmatmul.mubr.f32.vlgmr.msra.gmra.mrb[48].mxu1 %v1156_v22 }
 0x465   :  { %2587 = vmatpush3.bf16.xpose.msk.msra.mxu1 %vm3818_vm1, %v3897_v44  ;;  %v2811_v44 = vunpack.i.h.bf16 %v2809_v10 }
 0x466   :  { %2590 = vmatprep.subr.msk.bf16.mxu1 %vm3818_vm1, %v2588_v12 }
 0x467   :  { %v2606_v45 = vpack.c.bf16 %v2811_v44, %v2810_v7 }
 0x46d   :  { %2593 = vmatpush3.bf16.xpose.msk.msra.mxu1 %vm3818_vm1, %v2588_v12 }
 0x46e   :  { %2596 = vmatprep.subr.msk.bf16.mxu1 %vm3818_vm1, %v2594_v40 }
 0x475   :  { %2599 = vmatpush3.bf16.xpose.msk.msra.mxu1 %vm3818_vm1, %v2594_v40 }
 0x476   :  { %2602 = vmatprep.subr.msk.bf16.mxu1 %vm3818_vm1, %v2600_v6 }
 0x47d   :  { %2605 = vmatpush3.bf16.xpose.msk.msra.mxu1 %vm3818_vm1, %v2600_v6 }
 0x47e   :  { %2608 = vmatprep.subr.msk.bf16.mxu1 %vm3818_vm1, %v2606_v45 }
 0x485   :  { %2611 = vmatpush3.bf16.xpose.msk.msra.mxu1 %vm3818_vm1, %v2606_v45 }
 0x48a   :  { %v1114_v3 = vpop.xlane.xlu0 %1113 }
 0x48b   :  { %2863 = vrcp.f32 %v1114_v3 }
 0x48e   :  { %v1112_v0 = vpop.xlane.xlu1 %1111 }
 0x48f   :  { %2865 = vrcp.f32 %v1112_v0 }
 0x492   :  { %v1118_v8 = vpop.xlane.xlu0 %1117  ;;  %v1116_v53 = vpop.xlane.xlu1 %1115 }
 0x493   :  { %2867 = vrcp.f32 %v1118_v8 }
 0x494   :  { %2869 = vrcp.f32 %v1116_v53 }
 0x495   :  { %v2864_v21 = vpop.eup %2863 }
 0x496   :  { %v1122_v58 = vpop.xlane.xlu0 %1121  ;;  %v1158_v22 = vmul.f32 %v2864_v21, %v4086_v47 }
 0x497   :  { %2871 = vrcp.f32 %v1122_v58 }
 0x499   :  { %v2866_v63 = vpop.eup %2865 }
 0x49a   :  { %v1120_v37 = vpop.xlane.xlu0 %1119  ;;  %v1157_v27 = vmul.f32 %v2866_v63, %v4089_v24 }
 0x49b   :  { %2873 = vrcp.f32 %v1120_v37 }
 0x49c   :  { %2273 = vmatprep.mubr.f32.mxu1 %v1157_v27 }
 0x49d   :  { %v2868_v12 = vpop.eup %2867  ;;  %2274 = vmatmul.mubr.f32.gmra.mrb[50].mxu1 %v1158_v22 }
 0x49e   :  { %v2870_v26 = vpop.eup %2869  ;;  %v1126_v19 = vpop.xlane.xlu0 %1125  ;;  %v1160_v40 = vmul.f32 %v2868_v12, %v4095_v43 }
 0x49f   :  { %v1159_v33 = vmul.f32 %v2870_v26, %v4093_v18  ;;  %2875 = vrcp.f32 %v1126_v19  ;;  %v1130_v50 = vpop.xlane.xlu1 %1129 }
 0x4a1   :  { %2276 = vmatprep.mubr.f32.mxu1 %v1159_v33  ;;  %v2872_v6 = vpop.eup %2871 }
 0x4a2   :  { %2277 = vmatmul.mubr.f32.gmra.mrb[52].mxu1 %v1160_v40  ;;  %v1124_v41 = vpop.xlane.xlu0 %1123  ;;  %v1162_v7 = vmul.f32 %v2872_v6, %v4100_v28 }
 0x4a3   :  { %2877 = vrcp.f32 %v1124_v41 }
 0x4a4   :  { %2879 = vrcp.f32 %v1130_v50 }
 0x4a5   :  { %v2874_v24 = vpop.eup %2873 }
 0x4a6   :  { %v1128_v10 = vpop.xlane.xlu0 %1127  ;;  %v1138_v47 = vpop.xlane.xlu1 %1137  ;;  %v1161_v44 = vmul.f32 %v2874_v24, %v4105_v52 }
 0x4a7   :  { %2881 = vrcp.f32 %v1128_v10 }
 0x4a8   :  { %2279 = vmatprep.mubr.f32.mxu1 %v1161_v44 }
 0x4a9   :  { %2280 = vmatmul.mubr.f32.gmra.mrb[54].mxu1 %v1162_v7  ;;  %v2876_v0 = vpop.eup %2875 }
 0x4aa   :  { %v1134_v43 = vpop.xlane.xlu0 %1133  ;;  %v2814_v18 = vpop.permute.xlu1 %2813  ;;  %v1164_v28 = vmul.f32 %v2876_v0, %v4109_v25 }
 0x4ab   :  { %v2816_v45 = vunpack.i.h.bf16 %v2814_v18  ;;  %v2815_v3 = vunpack.i.l.bf16 %v2814_v18  ;;  %2883 = vrcp.f32 %v1134_v43 }
 0x4ad   :  { %v2878_v8 = vpop.eup %2877  ;;  %v2612_v53 = vpack.c.bf16 %v2816_v45, %v2815_v3  ;;  %v4513_v45 = vld [vmem:[#allocation13_spill] sm:$0xff] }
 0x4ae   :  { %v1132_v58 = vpop.xlane.xlu0 %1131  ;;  %v2819_v21 = vpop.permute.xlu1 %2818  ;;  %v1163_v63 = vmul.f32 %v2878_v8, %v4116_v48 }
 0x4af   :  { %2885 = vrcp.f32 %v1132_v58  ;;  %v2821_v37 = vunpack.i.h.bf16 %v2819_v21  ;;  %v2820_v52 = vunpack.i.l.bf16 %v2819_v21  ;;  %2614 = vmatprep.subr.msk.bf16.mxu1 %vm3818_vm1, %v2612_v53  ;;  %v2880_v27 = vpop.eup %2879 }
 0x4b0   :  { %2282 = vmatprep.mubr.f32.mxu1 %v1163_v63  ;;  %2617 = vmatpush3.bf16.xpose.msk.msra.mxu1 %vm3818_vm1, %v2612_v53  ;;  %2887 = vrcp.f32 %v1138_v47  ;;  %v1166_v25 = vmul.f32 %v2880_v27, %v4111_v62 }
 0x4b1   :  { %v2882_v22 = vpop.eup %2881  ;;  %v2618_v12 = vpack.c.bf16 %v2821_v37, %v2820_v52  ;;  %2283 = vmatmul.mubr.f32.gmra.mrb[56].mxu1 %v1164_v28 }
 0x4b2   :  { %v1136_v26 = vpop.xlane.xlu0 %1135  ;;  %v2824_v19 = vpop.permute.xlu1 %2823  ;;  %v1165_v48 = vmul.f32 %v2882_v22, %v4119_v56 }
 0x4b3   :  { %2889 = vrcp.f32 %v1136_v26  ;;  %v2826_v40 = vunpack.i.h.bf16 %v2824_v19  ;;  %v2825_v33 = vunpack.i.l.bf16 %v2824_v19  ;;  %2620 = vmatprep.subr.msk.bf16.mxu1 %vm3818_vm1, %v2618_v12 }
 0x4b4   :  { %2285 = vmatprep.mubr.f32.mxu1 %v1165_v48 }
 0x4b5   :  { %2286 = vmatmul.mubr.f32.gmra.mrb[58].mxu1 %v1166_v25  ;;  %v2624_v50 = vpack.c.bf16 %v2826_v40, %v2825_v33  ;;  %v2884_v41 = vpop.eup %2883 }
 0x4b6   :  { %v1168_v24 = vmul.f32 %v2884_v41, %v4125_v61 }
 0x4b8   :  { %2623 = vmatpush3.bf16.xpose.msk.msra.mxu1 %vm3818_vm1, %v2618_v12 }
 0x4b9   :  { %v2886_v6 = vpop.eup %2885  ;;  %2626 = vmatprep.subr.msk.bf16.mxu1 %vm3818_vm1, %v2624_v50 }
 0x4ba   :  { %v1167_v56 = vmul.f32 %v2886_v6, %v4128_v15  ;;  %v2888_v10 = vpop.eup %2887 }
 0x4bb   :  { %v1170_v44 = vmul.f32 %v2888_v10, %v4121_v2 }
 0x4bc   :  { %2288 = vmatprep.mubr.f32.mxu1 %v1167_v56 }
 0x4bd   :  { %v2890_v47 = vpop.eup %2889  ;;  %2289 = vmatmul.mubr.f32.gmra.mrb[60].mxu1 %v1168_v24 }
 0x4be   :  { %v1169_v62 = vmul.f32 %v2890_v47, %v4131_v31 }
 0x4c0   :  { %2291 = vmatprep.mubr.f32.mxu1 %v1169_v62  ;;  %2629 = vmatpush3.bf16.xpose.msk.msra.mxu1 %vm3818_vm1, %v2624_v50 }
 0x4c1   :  { %2292 = vmatmul.mubr.f32.gmra.mrb[62].mxu1 %v1170_v44  ;;  %2631 = vmatprep.subr.bf16.mxu1 %v3691_v36 }
 0x4c2   :  { %2326 = vmatprep.mubr.msk.f32.mxu1 %vm801_vm0, %v3687_v30 }
 0x4c7   :  { %2327 = vmatmul.mubr.msk.f32.vlgmr.msra.gmra.mrb[64].mxu1 %vm801_vm0, %v3689_v34 }
 0x4c8   :  { %2329 = vmatprep.mubr.msk.f32.mxu1 %vm801_vm0, %v3693_v39  ;;  %2633 = vmatpush3.bf16.msra.mxu1 %v3691_v36 }
 0x4c9   :  { %2635 = vmatprep.subr.bf16.mxu1 %v3697_v20 }
 0x4cb   :  { %2330 = vmatmul.mubr.msk.f32.gmra.mrb[66].mxu1 %vm801_vm0, %v3695_v9 }
 0x4cc   :  { %2332 = vmatprep.mubr.msk.f32.mxu1 %vm801_vm0, %v3699_v23  ;;  %2637 = vmatpush3.bf16.msra.mxu1 %v3697_v20 }
 0x4cd   :  { %2639 = vmatprep.subr.bf16.mxu1 %v3703_v46 }
 0x4cf   :  { %2333 = vmatmul.mubr.msk.f32.gmra.mrb[68].mxu1 %vm801_vm0, %v3701_v38 }
 0x4d0   :  { %2335 = vmatprep.mubr.msk.f32.mxu1 %vm801_vm0, %v3705_v49  ;;  %2641 = vmatpush3.bf16.msra.mxu1 %v3703_v46 }
 0x4d1   :  { %2643 = vmatprep.subr.bf16.mxu1 %v3709_v57 }
 0x4d3   :  { %2336 = vmatmul.mubr.msk.f32.gmra.mrb[70].mxu1 %vm801_vm0, %v3707_v54 }
 0x4d4   :  { %2338 = vmatprep.mubr.msk.f32.mxu1 %vm801_vm0, %v3711_v59  ;;  %2645 = vmatpush3.bf16.msra.mxu1 %v3709_v57 }
 0x4d5   :  { %2647 = vmatprep.subr.bf16.mxu1 %v3715_v4 }
 0x4d7   :  { %2339 = vmatmul.mubr.msk.f32.gmra.mrb[72].mxu1 %vm801_vm0, %v3713_v1 }
 0x4d8   :  { %2341 = vmatprep.mubr.msk.f32.mxu1 %vm801_vm0, %v3717_v29  ;;  %2649 = vmatpush3.bf16.msra.mxu1 %v3715_v4 }
 0x4d9   :  { %2651 = vmatprep.subr.bf16.mxu1 %v3721_v35 }
 0x4db   :  { %2342 = vmatmul.mubr.msk.f32.gmra.mrb[74].mxu1 %vm801_vm0, %v3719_v32 }
 0x4dc   :  { %2344 = vmatprep.mubr.msk.f32.mxu1 %vm801_vm0, %v3724_v11  ;;  %2653 = vmatpush3.bf16.msra.mxu1 %v3721_v35 }
 0x4dd   :  { %2655 = vmatprep.subr.bf16.mxu1 %v3731_v16 }
 0x4df   :  { %2345 = vmatmul.mubr.msk.f32.gmra.mrb[76].mxu1 %vm801_vm0, %v3728_v13 }
 0x4e0   :  { %2347 = vmatprep.mubr.msk.f32.mxu1 %vm801_vm0, %v3734_v17  ;;  %2657 = vmatpush3.bf16.msra.mxu1 %v3731_v16 }
 0x4e1   :  { %2659 = vmatprep.subr.bf16.mxu1 %v3741_v42 }
 0x4e3   :  { %2348 = vmatmul.mubr.msk.f32.gmra.mrb[78].mxu1 %vm801_vm0, %v3738_v14  ;;  %v4509_v14 = vld [vmem:[#allocation14_spill] sm:$0xff] }
 0x4e4   :  { %2661 = vmatpush3.bf16.msra.mxu1 %v3741_v42  ;;  %vm4510_vm1 = vcmp.le.s32.totalorder %v3907_v55, %v4509_v14 }
 0x537   :  { %v4242_v30 = vpop.f32.mrb[48].mxu1 }
 0x538   :  { %v4244_v34 = vpop.f32.mrb[49].mxu1 }
 0x570   :  { %v4246_v36 = vpop.f32.mrb[50].mxu1 }
 0x571   :  { %v4248_v39 = vpop.f32.mrb[51].mxu1 }
 0x575   :  { %v4250_v9 = vpop.f32.mrb[52].mxu1 }
 0x576   :  { %v4252_v20 = vpop.f32.mrb[53].mxu1 }
 0x57c   :  { %v4254_v23 = vpop.f32.mrb[54].mxu1 }
 0x57d   :  { %v4256_v38 = vpop.f32.mrb[55].mxu1 }
 0x584   :  { %v4258_v46 = vpop.f32.mrb[56].mxu1 }
 0x585   :  { %v4260_v49 = vpop.f32.mrb[57].mxu1 }
 0x588   :  { %v4262_v54 = vpop.f32.mrb[58].mxu1 }
 0x589   :  { %v4264_v57 = vpop.f32.mrb[59].mxu1 }
 0x590   :  { %v4266_v59 = vpop.f32.mrb[60].mxu1 }
 0x591   :  { %v4268_v1 = vpop.f32.mrb[61].mxu1 }
 0x594   :  { %v4270_v4 = vpop.f32.mrb[62].mxu1 }
 0x595   :  { %v4272_v29 = vpop.f32.mrb[63].mxu1 }
 0x59a   :  { %v2328_v32 = vpop.f32.mrb[64].mxu1 }
 0x59b   :  { %v1494_v35 = vpop.f32.mrb[65].mxu1  ;;  %v1574_v11 = vsel %vm738_vm10, %v2328_v32, -inf  ;;  %vm4514_vm10 = vcmp.le.s32.totalorder %v3907_v55, %v4513_v45 }
 0x59c   :  { %1591 = vmax.xlane.f32.xlu1 %v1574_v11  ;;  %v1573_v13 = vsel %vm737_vm11, %v1494_v35, -inf }
 0x59d   :  { %1589 = vmax.xlane.f32.xlu0 %v1573_v13 }
 0x59e   :  { %v2331_v16 = vpop.f32.mrb[66].mxu1 }
 0x59f   :  { %v1504_v17 = vpop.f32.mrb[67].mxu1  ;;  %v1576_v42 = vsel %vm4510_vm1, %v2331_v16, -inf }
 0x5a0   :  { %v1575_v60 = vsel %vm739_vm15, %v1504_v17, -inf }
 0x5a1   :  { %1595 = vmax.xlane.f32.xlu0 %v1576_v42 }
 0x5a2   :  { %v2334_v5 = vpop.f32.mrb[68].mxu1 }
 0x5a3   :  { %v1514_v2 = vpop.f32.mrb[69].mxu1  ;;  %v1578_v7 = vsel %vm742_vm13, %v2334_v5, -inf }
 0x5a4   :  { %v1577_v3 = vsel %vm4514_vm10, %v1514_v2, -inf }
 0x5a5   :  { %1593 = vmax.xlane.f32.xlu0 %v1575_v60 }
 0x5a6   :  { %v2337_v15 = vpop.f32.mrb[70].mxu1 }
 0x5a7   :  { %v1524_v31 = vpop.f32.mrb[71].mxu1  ;;  %v1580_v63 = vsel %vm744_vm2, %v2337_v15, -inf }
 0x5a8   :  { %v1579_v12 = vsel %vm743_vm14, %v1524_v31, -inf }
 0x5a9   :  { %1599 = vmax.xlane.f32.xlu0 %v1578_v7 }
 0x5aa   :  { %v2340_v43 = vpop.f32.mrb[72].mxu1 }
 0x5ab   :  { %v1534_v18 = vpop.f32.mrb[73].mxu1  ;;  %v1582_v25 = vsel %vm746_vm3, %v2340_v43, -inf }
 0x5ac   :  { %v4322_v41 = vsel %vm745_vm12, %v1534_v18, -inf }
 0x5ad   :  { %1597 = vmax.xlane.f32.xlu0 %v1577_v3 }
 0x5ae   :  { %v2343_v0 = vpop.f32.mrb[74].mxu1 }
 0x5af   :  { %v1544_v8 = vpop.f32.mrb[75].mxu1  ;;  %v4295_v58 = vsel %vm748_vm4, %v2343_v0, -inf }
 0x5b0   :  { %1611 = vmax.xlane.f32.xlu1 %v4295_v58  ;;  %v4328_v56 = vsel %vm747_vm5, %v1544_v8, -inf }
 0x5b1   :  { %1603 = vmax.xlane.f32.xlu0 %v1580_v63 }
 0x5b2   :  { %v2346_v37 = vpop.f32.mrb[76].mxu1 }
 0x5b3   :  { %v1554_v52 = vpop.f32.mrb[77].mxu1  ;;  %v4304_v27 = vsel %vm750_vm6, %v2346_v37, -inf }
 0x5b4   :  { %1615 = vmax.xlane.f32.xlu1 %v4304_v27  ;;  %v4334_v10 = vsel %vm749_vm7, %v1554_v52, -inf }
 0x5b5   :  { %1601 = vmax.xlane.f32.xlu0 %v1579_v12 }
 0x5b6   :  { %v2349_v26 = vpop.f32.mrb[78].mxu1 }
 0x5b7   :  { %v1564_v19 = vpop.f32.mrb[79].mxu1  ;;  %v4313_v40 = vsel %vm752_vm8, %v2349_v26, -inf }
 0x5b8   :  { %1619 = vmax.xlane.f32.xlu1 %v4313_v40  ;;  %v4340_v62 = vsel %vm751_vm9, %v1564_v19, -inf }
 0x5b9   :  { %1607 = vmax.xlane.f32.xlu0 %v1582_v25 }
 0x5bd   :  { %1605 = vmax.xlane.f32.xlu0 %v4322_v41 }
 0x5c1   :  { %1609 = vmax.xlane.f32.xlu0 %v4328_v56 }
 0x5c5   :  { %1613 = vmax.xlane.f32.xlu0 %v4334_v10 }
 0x5c9   :  { %1617 = vmax.xlane.f32.xlu0 %v4340_v62 }
 0x629   :  { %v1592_v44 = vpop.xlane.xlu1 %1591 }
 0x62a   :  { %v1622_v32 = vsub.f32 %v1574_v11, %v1592_v44  ;;  %v1590_v35 = vpop.xlane.xlu0 %1589 }
 0x62b   :  { %v1621_v16 = vsub.f32 %v1573_v13, %v1590_v35 }
 0x62c   :  { %v1639_v17 = vmul.f32 1.442695, %v1622_v32 }
 0x62d   :  { %v1637_v14 = vmul.f32 1.442695, %v1621_v16 }
 0x62e   :  { %2891 = vpow2.f32 %v1639_v17  ;;  %v1596_v5 = vpop.xlane.xlu0 %1595 }
 0x62f   :  { %2893 = vpow2.f32 %v1637_v14  ;;  %v1624_v2 = vsub.f32 %v1576_v42, %v1596_v5 }
 0x631   :  { %v1643_v61 = vmul.f32 1.442695, %v1624_v2 }
 0x632   :  { %v1594_v15 = vpop.xlane.xlu0 %1593 }
 0x633   :  { %2895 = vpow2.f32 %v1643_v61  ;;  %v1623_v31 = vsub.f32 %v1575_v60, %v1594_v15 }
 0x635   :  { %v1641_v51 = vmul.f32 1.442695, %v1623_v31 }
 0x636   :  { %v1600_v55 = vpop.xlane.xlu0 %1599 }
 0x637   :  { %2897 = vpow2.f32 %v1641_v51  ;;  %v1626_v43 = vsub.f32 %v1578_v7, %v1600_v55 }
 0x638   :  { %v4343_v18 = vpop.eup %2891 }
 0x639   :  { %v4345_v45 = vpop.eup %2893  ;;  %v1647_v11 = vmul.f32 1.442695, %v1626_v43  ;;  %1671 = vadd.xlane.f32.xlu1 %v4343_v18 }
 0x63a   :  { %v1598_v13 = vpop.xlane.xlu0 %1597  ;;  %1669 = vadd.xlane.f32.xlu0 %v4345_v45 }
 0x63b   :  { %2899 = vpow2.f32 %v1647_v11  ;;  %v1625_v42 = vsub.f32 %v1577_v3, %v1598_v13 }
 0x63d   :  { %v4349_v0 = vpop.eup %2895  ;;  %v1645_v8 = vmul.f32 1.442695, %v1625_v42  ;;  %v1612_v7 = vpop.xlane.xlu1 %1611 }
 0x63e   :  { %v1604_v60 = vpop.xlane.xlu0 %1603  ;;  %1675 = vadd.xlane.f32.xlu1 %v4349_v0  ;;  %v1632_v19 = vsub.f32 %v4295_v58, %v1612_v7 }
 0x63f   :  { %2901 = vpow2.f32 %v1645_v8  ;;  %v1628_v53 = vsub.f32 %v1580_v63, %v1604_v60 }
 0x640   :  { %v1659_v6 = vmul.f32 1.442695, %v1632_v19 }
 0x641   :  { %v4352_v21 = vpop.eup %2897  ;;  %v1651_v37 = vmul.f32 1.442695, %v1628_v53  ;;  %v1616_v3 = vpop.xlane.xlu1 %1615 }
 0x642   :  { %v1602_v52 = vpop.xlane.xlu0 %1601  ;;  %1673 = vadd.xlane.f32.xlu0 %v4352_v21  ;;  %v1634_v24 = vsub.f32 %v4304_v27, %v1616_v3 }
 0x643   :  { %2903 = vpow2.f32 %v1651_v37  ;;  %v1627_v28 = vsub.f32 %v1579_v12, %v1602_v52 }
 0x644   :  { %v1663_v35 = vmul.f32 1.442695, %v1634_v24 }
 0x645   :  { %v4355_v22 = vpop.eup %2899  ;;  %v1649_v26 = vmul.f32 1.442695, %v1627_v28  ;;  %v1620_v12 = vpop.xlane.xlu1 %1619 }
 0x646   :  { %v1608_v48 = vpop.xlane.xlu0 %1607  ;;  %1679 = vadd.xlane.f32.xlu1 %v4355_v22 }
 0x647   :  { %2905 = vpow2.f32 %v1649_v26  ;;  %v1630_v33 = vsub.f32 %v1582_v25, %v1608_v48  ;;  %v1636_v25 = vsub.f32 %v4313_v40, %v1620_v12 }
 0x649   :  { %v4359_v63 = vpop.eup %2901  ;;  %v1655_v50 = vmul.f32 1.442695, %v1630_v33  ;;  %v1667_v5 = vmul.f32 1.442695, %v1636_v25 }
 0x64a   :  { %v1606_v47 = vpop.xlane.xlu0 %1605  ;;  %1677 = vadd.xlane.f32.xlu0 %v4359_v63 }
 0x64b   :  { %2907 = vpow2.f32 %v1655_v50  ;;  %v1629_v44 = vsub.f32 %v4322_v41, %v1606_v47 }
 0x64c   :  { %2909 = vpow2.f32 %v1659_v6 }
 0x64d   :  { %v4364_v32 = vpop.eup %2903  ;;  %v1653_v58 = vmul.f32 1.442695, %v1629_v44 }
 0x64e   :  { %v1610_v16 = vpop.xlane.xlu0 %1609  ;;  %1683 = vadd.xlane.f32.xlu1 %v4364_v32 }
 0x64f   :  { %2911 = vpow2.f32 %v1653_v58  ;;  %v1631_v27 = vsub.f32 %v4328_v56, %v1610_v16 }
 0x650   :  { %2913 = vpow2.f32 %v1663_v35 }
 0x651   :  { %v4369_v17 = vpop.eup %2905  ;;  %v1657_v14 = vmul.f32 1.442695, %v1631_v27 }
 0x652   :  { %v1614_v2 = vpop.xlane.xlu0 %1613  ;;  %1681 = vadd.xlane.f32.xlu0 %v4369_v17 }
 0x653   :  { %2915 = vpow2.f32 %v1657_v14  ;;  %v1633_v41 = vsub.f32 %v4334_v10, %v1614_v2 }
 0x654   :  { %2917 = vpow2.f32 %v1667_v5 }
 0x655   :  { %v4373_v61 = vpop.eup %2907  ;;  %v1661_v40 = vmul.f32 1.442695, %v1633_v41 }
 0x656   :  { %1687 = vadd.xlane.f32.xlu1 %v4373_v61  ;;  %v1618_v15 = vpop.xlane.xlu0 %1617  ;;  %v4377_v31 = vpop.eup %2909 }
 0x657   :  { %2919 = vpow2.f32 %v1661_v40  ;;  %v1635_v56 = vsub.f32 %v4340_v62, %v1618_v15 }
 0x659   :  { %v4379_v51 = vpop.eup %2911  ;;  %v1665_v55 = vmul.f32 1.442695, %v1635_v56 }
 0x65a   :  { %1691 = vadd.xlane.f32.xlu1 %v4377_v31  ;;  %1685 = vadd.xlane.f32.xlu0 %v4379_v51  ;;  %v4383_v10 = vpop.eup %2913 }
 0x65b   :  { %2921 = vpow2.f32 %v1665_v55 }
 0x65d   :  { %v4385_v43 = vpop.eup %2915 }
 0x65e   :  { %1695 = vadd.xlane.f32.xlu1 %v4383_v10  ;;  %1689 = vadd.xlane.f32.xlu0 %v4385_v43  ;;  %v4389_v11 = vpop.eup %2917 }
 0x661   :  { %v4391_v62 = vpop.eup %2919 }
 0x662   :  { %1699 = vadd.xlane.f32.xlu1 %v4389_v11  ;;  %1693 = vadd.xlane.f32.xlu0 %v4391_v62 }
 0x665   :  { %v4395_v13 = vpop.eup %2921 }
 0x666   :  { %1697 = vadd.xlane.f32.xlu0 %v4395_v13 }
 0x6c6   :  { %v1672_v42 = vpop.xlane.xlu1 %1671 }
 0x6c7   :  { %2923 = vrcp.f32 %v1672_v42  ;;  %v1670_v8 = vpop.xlane.xlu0 %1669 }
 0x6c8   :  { %2925 = vrcp.f32 %v1670_v8 }
 0x6cb   :  { %v1676_v60 = vpop.xlane.xlu1 %1675 }
 0x6cc   :  { %2927 = vrcp.f32 %v1676_v60 }
 0x6cf   :  { %v1674_v7 = vpop.xlane.xlu0 %1673 }
 0x6d0   :  { %2929 = vrcp.f32 %v1674_v7 }
 0x6d1   :  { %v2924_v53 = vpop.eup %2923 }
 0x6d2   :  { %v2926_v37 = vpop.eup %2925  ;;  %v1718_v28 = vmul.f32 %v2924_v53, %v4343_v18 }
 0x6d3   :  { %v1717_v52 = vmul.f32 %v2926_v37, %v4345_v45  ;;  %v1680_v3 = vpop.xlane.xlu1 %1679 }
 0x6d4   :  { %2931 = vrcp.f32 %v1680_v3 }
 0x6d5   :  { %2382 = vmatprep.mubr.f32.mxu1 %v1717_v52 }
 0x6d6   :  { %2383 = vmatmul.mubr.f32.vlgmr.msra.gmra.mrb[80].mxu1 %v1718_v28  ;;  %v2928_v19 = vpop.eup %2927 }
 0x6d7   :  { %v1678_v26 = vpop.xlane.xlu0 %1677  ;;  %v1720_v6 = vmul.f32 %v2928_v19, %v4349_v0 }
 0x6d8   :  { %2933 = vrcp.f32 %v1678_v26 }
 0x6da   :  { %v2930_v48 = vpop.eup %2929 }
 0x6db   :  { %v1719_v33 = vmul.f32 %v2930_v48, %v4352_v21  ;;  %v1684_v50 = vpop.xlane.xlu1 %1683 }
 0x6dc   :  { %2935 = vrcp.f32 %v1684_v50 }
 0x6dd   :  { %2385 = vmatprep.mubr.f32.mxu1 %v1719_v33 }
 0x6de   :  { %2386 = vmatmul.mubr.f32.gmra.mrb[82].mxu1 %v1720_v6  ;;  %v2932_v45 = vpop.eup %2931 }
 0x6df   :  { %v1682_v24 = vpop.xlane.xlu0 %1681  ;;  %v1722_v44 = vmul.f32 %v2932_v45, %v4355_v22 }
 0x6e0   :  { %2937 = vrcp.f32 %v1682_v24 }
 0x6e2   :  { %v2934_v18 = vpop.eup %2933 }
 0x6e3   :  { %v1688_v47 = vpop.xlane.xlu1 %1687  ;;  %v1721_v12 = vmul.f32 %v2934_v18, %v4359_v63 }
 0x6e4   :  { %2939 = vrcp.f32 %v1688_v47 }
 0x6e5   :  { %2388 = vmatprep.mubr.f32.mxu1 %v1721_v12 }
 0x6e6   :  { %2389 = vmatmul.mubr.f32.gmra.mrb[84].mxu1 %v1722_v44  ;;  %v2936_v21 = vpop.eup %2935 }
 0x6e7   :  { %v1692_v58 = vpop.xlane.xlu1 %1691  ;;  %v1686_v35 = vpop.xlane.xlu0 %1685  ;;  %v1724_v14 = vmul.f32 %v2936_v21, %v4364_v32 }
 0x6e8   :  { %2941 = vrcp.f32 %v1686_v35 }
 0x6e9   :  { %2943 = vrcp.f32 %v1692_v58 }
 0x6ea   :  { %v2938_v0 = vpop.eup %2937 }
 0x6eb   :  { %v1696_v25 = vpop.xlane.xlu1 %1695  ;;  %v1690_v16 = vpop.xlane.xlu0 %1689  ;;  %v1723_v27 = vmul.f32 %v2938_v0, %v4369_v17 }
 0x6ec   :  { %2945 = vrcp.f32 %v1690_v16 }
 0x6ed   :  { %2391 = vmatprep.mubr.f32.mxu1 %v1723_v27  ;;  %2947 = vrcp.f32 %v1696_v25 }
 0x6ee   :  { %2392 = vmatmul.mubr.f32.gmra.mrb[86].mxu1 %v1724_v14  ;;  %v2940_v5 = vpop.eup %2939 }
 0x6ef   :  { %v1694_v63 = vpop.xlane.xlu0 %1693  ;;  %v1700_v22 = vpop.xlane.xlu1 %1699  ;;  %v1726_v15 = vmul.f32 %v2940_v5, %v4373_v61 }
 0x6f0   :  { %2949 = vrcp.f32 %v1694_v63 }
 0x6f1   :  { %2951 = vrcp.f32 %v1700_v22 }
 0x6f2   :  { %v2942_v2 = vpop.eup %2941 }
 0x6f3   :  { %v1698_v41 = vpop.xlane.xlu0 %1697  ;;  %v1725_v40 = vmul.f32 %v2942_v2, %v4379_v51  ;;  %v2944_v17 = vpop.eup %2943 }
 0x6f4   :  { %2953 = vrcp.f32 %v1698_v41  ;;  %v1728_v55 = vmul.f32 %v2944_v17, %v4377_v31 }
 0x6f5   :  { %2394 = vmatprep.mubr.f32.mxu1 %v1725_v40 }
 0x6f6   :  { %v2946_v56 = vpop.eup %2945  ;;  %2395 = vmatmul.mubr.f32.gmra.mrb[88].mxu1 %v1726_v15 }
 0x6f7   :  { %v1727_v32 = vmul.f32 %v2946_v56, %v4385_v43  ;;  %v2948_v42 = vpop.eup %2947 }
 0x6f8   :  { %v1730_v53 = vmul.f32 %v2948_v42, %v4383_v10 }
 0x6f9   :  { %2397 = vmatprep.mubr.f32.mxu1 %v1727_v32 }
 0x6fa   :  { %v2950_v8 = vpop.eup %2949  ;;  %2398 = vmatmul.mubr.f32.gmra.mrb[90].mxu1 %v1728_v55 }
 0x6fb   :  { %v1729_v60 = vmul.f32 %v2950_v8, %v4391_v62  ;;  %v2952_v7 = vpop.eup %2951 }
 0x6fc   :  { %v1732_v37 = vmul.f32 %v2952_v7, %v4389_v11 }
 0x6fd   :  { %2400 = vmatprep.mubr.f32.mxu1 %v1729_v60 }
 0x6fe   :  { %v2954_v51 = vpop.eup %2953  ;;  %2401 = vmatmul.mubr.f32.gmra.mrb[92].mxu1 %v1730_v53 }
 0x6ff   :  { %v1731_v61 = vmul.f32 %v2954_v51, %v4395_v13 }
 0x701   :  { %2403 = vmatprep.mubr.f32.mxu1 %v1731_v61 }
 0x702   :  { %2404 = vmatmul.mubr.f32.gmra.mrb[94].mxu1 %v1732_v37 }
 0x7a9   :  { %v2384_v43 = vpop.f32.mrb[80].mxu1 }
 0x7aa   :  { %1896 = vrot.lane.b32.xlu1 %v2384_v43, %s2980_s0  ;;  %v1799_v31 = vpop.f32.mrb[81].mxu1 }
 0x7ab   :  { %1894 = vrot.lane.b32.xlu0 %v1799_v31, %s2980_s0 }
 0x7b1   :  { %v2387_v52 = vpop.f32.mrb[82].mxu1 }
 0x7b2   :  { %1900 = vrot.lane.b32.xlu0 %v2387_v52, %s2980_s0  ;;  %v1809_v62 = vpop.f32.mrb[83].mxu1 }
 0x7b3   :  { %1898 = vrot.lane.b32.xlu1 %v1809_v62, %s2980_s0 }
 0x7b9   :  { %v2390_v10 = vpop.f32.mrb[84].mxu1 }
 0x7ba   :  { %1904 = vrot.lane.b32.xlu0 %v2390_v10, %s2980_s0  ;;  %v1819_v13 = vpop.f32.mrb[85].mxu1 }
 0x7bb   :  { %1902 = vrot.lane.b32.xlu1 %v1819_v13, %s2980_s0 }
 0x7c1   :  { %v2393_v11 = vpop.f32.mrb[86].mxu1 }
 0x7c2   :  { %1908 = vrot.lane.b32.xlu0 %v2393_v11, %s2980_s0  ;;  %v1829_v28 = vpop.f32.mrb[87].mxu1 }
 0x7c3   :  { %1906 = vrot.lane.b32.xlu1 %v1829_v28, %s2980_s0 }
 0x7c9   :  { %v2396_v3 = vpop.f32.mrb[88].mxu1 }
 0x7ca   :  { %1912 = vrot.lane.b32.xlu0 %v2396_v3, %s2980_s0  ;;  %v1839_v26 = vpop.f32.mrb[89].mxu1 }
 0x7cb   :  { %1910 = vrot.lane.b32.xlu1 %v1839_v26, %s2980_s0 }
 0x7cd   :  { %v2399_v19 = vpop.f32.mrb[90].mxu1 }
 0x7ce   :  { %1916 = vrot.lane.b32.xlu0 %v2399_v19, %s2980_s0  ;;  %v1849_v48 = vpop.f32.mrb[91].mxu1 }
 0x7cf   :  { %1914 = vrot.lane.b32.xlu1 %v1849_v48, %s2980_s0 }
 0x7d1   :  { %v2402_v33 = vpop.f32.mrb[92].mxu1 }
 0x7d2   :  { %1920 = vrot.lane.b32.xlu0 %v2402_v33, %s2980_s0  ;;  %v1859_v50 = vpop.f32.mrb[93].mxu1 }
 0x7d3   :  { %1918 = vrot.lane.b32.xlu1 %v1859_v50, %s2980_s0 }
 0x7d5   :  { %v2405_v6 = vpop.f32.mrb[94].mxu1 }
 0x7d6   :  { %1924 = vrot.lane.b32.xlu0 %v2405_v6, %s2980_s0  ;;  %v1869_v24 = vpop.f32.mrb[95].mxu1 }
 0x7d7   :  { %1922 = vrot.lane.b32.xlu1 %v1869_v24, %s2980_s0 }
 0x81c   :  { %v1897_v45 = vpop.permute.xlu1 %1896 }
 0x81d   :  { %v1943_v18 = vsel %vm801_vm0, %v4242_v30, %v1897_v45  ;;  %v1895_v47 = vpop.permute.xlu0 %1894 }
 0x81e   :  { %1959 = vst [vmem:[#allocation2 + $0x8] sm:$0xff] %v1943_v18  ;;  %v1942_v12 = vsel %vm801_vm0, %v4244_v34, %v1895_v47 }
 0x81f   :  { %1958 = vst [vmem:[#allocation2] sm:$0xff] %v1942_v12 }
 0x824   :  { %v1901_v44 = vpop.permute.xlu0 %1900 }
 0x825   :  { %v1945_v58 = vsel %vm801_vm0, %v4246_v36, %v1901_v44  ;;  %v1899_v35 = vpop.permute.xlu1 %1898 }
 0x826   :  { %1961 = vst [vmem:[#allocation2 + $0x18] sm:$0xff] %v1945_v58  ;;  %v1944_v21 = vsel %vm801_vm0, %v4248_v39, %v1899_v35 }
 0x827   :  { %1960 = vst [vmem:[#allocation2 + $0x10] sm:$0xff] %v1944_v21 }
 0x82c   :  { %v1905_v0 = vpop.permute.xlu0 %1904 }
 0x82d   :  { %v1947_v30 = vsel %vm801_vm0, %v4250_v9, %v1905_v0  ;;  %v1903_v25 = vpop.permute.xlu1 %1902 }
 0x82e   :  { %1963 = vst [vmem:[#allocation2 + $0x28] sm:$0xff] %v1947_v30  ;;  %v1946_v34 = vsel %vm801_vm0, %v4252_v20, %v1903_v25 }
 0x82f   :  { %1962 = vst [vmem:[#allocation2 + $0x20] sm:$0xff] %v1946_v34 }
 0x834   :  { %v1909_v16 = vpop.permute.xlu0 %1908 }
 0x835   :  { %v1949_v36 = vsel %vm801_vm0, %v4254_v23, %v1909_v16  ;;  %v1907_v27 = vpop.permute.xlu1 %1906 }
 0x836   :  { %1965 = vst [vmem:[#allocation2 + $0x38] sm:$0xff] %v1949_v36  ;;  %v1948_v39 = vsel %vm801_vm0, %v4256_v38, %v1907_v27 }
 0x837   :  { %1964 = vst [vmem:[#allocation2 + $0x30] sm:$0xff] %v1948_v39 }
 0x83c   :  { %v1913_v14 = vpop.permute.xlu0 %1912 }
 0x83d   :  { %v1951_v9 = vsel %vm801_vm0, %v4258_v46, %v1913_v14  ;;  %v1911_v63 = vpop.permute.xlu1 %1910 }
 0x83e   :  { %1967 = vst [vmem:[#allocation2 + $0x48] sm:$0xff] %v1951_v9  ;;  %v1950_v20 = vsel %vm801_vm0, %v4260_v49, %v1911_v63 }
 0x83f   :  { %1966 = vst [vmem:[#allocation2 + $0x40] sm:$0xff] %v1950_v20 }
 0x840   :  { %v1917_v22 = vpop.permute.xlu0 %1916 }
 0x841   :  { %v1953_v23 = vsel %vm801_vm0, %v4262_v54, %v1917_v22  ;;  %v1915_v5 = vpop.permute.xlu1 %1914 }
 0x842   :  { %1969 = vst [vmem:[#allocation2 + $0x58] sm:$0xff] %v1953_v23  ;;  %v1952_v38 = vsel %vm801_vm0, %v4264_v57, %v1915_v5 }
 0x843   :  { %1968 = vst [vmem:[#allocation2 + $0x50] sm:$0xff] %v1952_v38 }
 0x844   :  { %v1921_v2 = vpop.permute.xlu0 %1920 }
 0x845   :  { %v1955_v46 = vsel %vm801_vm0, %v4266_v59, %v1921_v2  ;;  %v1919_v41 = vpop.permute.xlu1 %1918 }
 0x846   :  { %1971 = vst [vmem:[#allocation2 + $0x68] sm:$0xff] %v1955_v46  ;;  %v1954_v49 = vsel %vm801_vm0, %v4268_v1, %v1919_v41 }
 0x847   :  { %1970 = vst [vmem:[#allocation2 + $0x60] sm:$0xff] %v1954_v49 }
 0x848   :  { %v1925_v40 = vpop.permute.xlu0 %1924 }
 0x849   :  { %v1957_v54 = vsel %vm801_vm0, %v4270_v4, %v1925_v40  ;;  %v1923_v15 = vpop.permute.xlu1 %1922 }
 0x84a   :  { %1973 = vst [vmem:[#allocation2 + $0x78] sm:$0xff] %v1957_v54  ;;  %v1956_v57 = vsel %vm801_vm0, %v4272_v29, %v1923_v15 }
 0x84b   :  { %1972 = vst [vmem:[#allocation2 + $0x70] sm:$0xff] %v1956_v57 }
 0x84c   :  { %2966 = shalt.err (!%p2963_p4)
}
 0x84d   :  { %s2967_s27 = scalar_lea.hbm %s4476_s2, 2048 }
 0x84e   :  { %p2968_p5 = scmp.ne.s32.totalorder %s4476_s2, %s2967_s27  ;;  %p2971_p6 = scmp.lt.u32.totalorder %s2967_s27, %s4476_s2 }
 0x850   :  { %p2973_p7 = pnand %p2971_p6, %p2968_p5 }
 0x852   :  { %2976 = shalt.err (!%p2973_p7)
}
 0x853   :  { %s2982_s4 = smov 128   ;;  %s2983_s5 = smov 8  }
 0x854   :  { %1985 = dma.vmem_to_hbm [thread:$0]  %s1980_s23, 2048, %s4476_s2, [#allocation3], %s2982_s4, %s2982_s4, %s2983_s5  }
 0x855   :  { %2977 = dma.done.wait [#allocation3], 2048  }
 0x856   :  { %2978 = vsyncadd [#allocation3], 4294965248 }
 0x857   :  { %1989 = vsyncpa [#allocation3], 1 }

</bundles_post_ra>
